<compile_context>
chip_gen: v5e
topology: v5e:2x2
jax: 0.10.0
libtpu: 0.0.40
codegen_flags: <defaults>
</compile_context>

<pallas_src>
import functools

import jax
import jax.numpy as jnp
from jax.experimental import pallas as pl
from jax.experimental.pallas import tpu as pltpu

LEAKY_SLOPE = 0.01     # nn.LeakyReLU default negative_slope
PAD_N = 128            # lane-dense padded width for the head output slab


# ------------------------------ fused kernel ------------------------------- #
def _grunet_fused_kernel(
    xyz_ref,                              # (T*bs, 3*IN)   rows ordered t*bs+b
    w_lane_ref, b_lane_ref,               # (3*IN, 3*H), (1, 3*H)  block-diag lanes
    w_m2_ref, b_m2_ref,                   # (3*H, H), (1, H)       feed_list[2]
    w_m1a_ref, w_m1b_ref, b_m1_ref,       # (3*H, H), (H, H), (1, H)  feed_list[1]
    w_d0_ref, b_d0_ref,                   # (T*H, 4*H), (1, 4*H)   deepnet layer0 (4 nets on N)
    w_dh_ref, b_dh_ref,                   # (3, 4*H, 4*H), (3, 1, 4*H) block-diag hidden
    w_dl_ref, b_dl_ref,                   # (4*H, 4*H), (1, 4*H)   block-diag last layer
    w_hd_ref, w_hf_ref, b_h_ref,          # (4*H, PAD_N), (T*H, PAD_N), (1, PAD_N) heads
    out_ref,                              # (bs, PAD_N)    lane-dense head slab
    *, T, bs, H):
    f32 = jnp.float32
    leaky = lambda v: jnp.where(v >= 0, v, LEAKY_SLOPE * v)
    dot = lambda a, b: jnp.dot(a, b, preferred_element_type=f32)

    n_dn = w_d0_ref.shape[1]       # 4*H : [r1_dnet | dens0 | dens1 | dens2]
    n_pad = out_ref.shape[1]       # padded head width (128)

    # ---- lanes (lane2 stand-ins): all 3 fused via one block-diagonal matmul
    lanes = leaky(dot(xyz_ref[...], w_lane_ref[...]) + b_lane_ref[...])   # (T*bs, 3H) = [t0|t1|out2]

    # ---- lane_merge stand-ins: concat replaced by zero-padded split weights
    m2 = leaky(dot(lanes, w_m2_ref[...]) + b_m2_ref[...])                 # feed_list[2](t1, out2)
    m1 = leaky(dot(lanes, w_m1a_ref[...]) + dot(m2, w_m1b_ref[...])
               + b_m1_ref[...])                                           # feed_list[1](t0, m2), (T*bs, H)

    # ---- out_flat @ W decomposed per timestep (no in-kernel reshape)
    acc_d = jnp.zeros((bs, n_dn), f32)     # 4 deepnets' first layers, batched on N
    acc_h = jnp.zeros((bs, n_pad), f32)    # heads: out_flat contribution
    for t in range(T):                      # static, fully unrolled (T small)
        rows = m1[t * bs:(t + 1) * bs, :]                         # out[:, t, :]  (bs, H)
        acc_d = acc_d + dot(rows, w_d0_ref[t * H:(t + 1) * H, :])
        acc_h = acc_h + dot(rows, w_hf_ref[t * H:(t + 1) * H, :])

    # ---- Deepnet stand-ins: r1_dnet + 3 dens, block-diagonal hidden layers
    a = leaky(acc_d + b_d0_ref[...])                              # layer 0 (leaky)
    for k in range(3):                                            # 3 hidden layers (leaky)
        a = leaky(dot(a, w_dh_ref[k]) + b_dh_ref[k])
    d = dot(a, w_dl_ref[...]) + b_dl_ref[...]                     # last layer, no activation
    # d = (bs, 4H) = [tmp | den0 | den1 | den2]

    # ---- lin_outs heads: cat([tmp, den_i, out_flat]) @ W_i via packed weights
    out_ref[...] = (dot(d, w_hd_ref[...]) + acc_h + b_h_ref[...]).astype(out_ref.dtype)


# --------------------------- parameter creation ---------------------------- #
def _init_linear(key, fan_in, fan_out):
    # Deterministic PyTorch-style uniform(-1/sqrt(fan_in), 1/sqrt(fan_in)).
    kw, kb = jax.random.split(key)
    bound = 1.0 / float(fan_in) ** 0.5
    w = jax.random.uniform(kw, (fan_in, fan_out), jnp.float32, -bound, bound)
    b = jax.random.uniform(kb, (fan_out,), jnp.float32, -bound, bound)
    return {"w": w, "b": b}


def _init_deepnet(key, in_dim, hidden, out_dim):
    # Deepnet(in_dim, [[h,h],[h,h],[h,h]], out_dim): in->h, h->h x3, h->out.
    keys = jax.random.split(key, 5)
    layers = [_init_linear(keys[0], in_dim, hidden)]
    for i in range(3):
        layers.append(_init_linear(keys[1 + i], hidden, hidden))
    layers.append(_init_linear(keys[4], hidden, out_dim))
    return layers


def make_params(key, lanes, inputs, backwards, hidden, output_dim):
    ks = jax.random.split(key, 4 * lanes + 1)
    return {
        "lanes": [_init_linear(ks[i], inputs, hidden) for i in range(lanes)],
        "merges": [_init_linear(ks[lanes + i], 2 * hidden, hidden) for i in range(lanes)],
        "r1_dnet": _init_deepnet(ks[2 * lanes], backwards * hidden, hidden, hidden),
        "dens": [
            _init_deepnet(ks[2 * lanes + 1 + i], backwards * hidden, hidden, hidden)
            for i in range(lanes)
        ],
        "lin_outs": [
            _init_linear(ks[3 * lanes + 1 + i], 2 * hidden + backwards * hidden, output_dim)
            for i in range(lanes)
        ],
    }


# ---------------------- pack weights for the fused kernel ------------------ #
def pack_params(params, *, lanes, inputs, backwards, hidden, output_dim, pad_n=PAD_N):
    H, T, IN, OUT, L = hidden, backwards, inputs, output_dim, lanes
    f32 = jnp.float32
    nd = L + 1            # deepnets batched along lanes: [r1_dnet, den0, den1, den2]
    n4 = nd * H

    # lanes -> block-diagonal (3*IN, 3*H); L columns ordered [t0 | t1 | out2]
    w_lane = jnp.zeros((L * IN, L * H), f32)
    b_lane = jnp.zeros((1, L * H), f32)
    for i in range(L):
        w_lane = w_lane.at[i * IN:(i + 1) * IN, i * H:(i + 1) * H].set(params["lanes"][i]["w"])
        b_lane = b_lane.at[0, i * H:(i + 1) * H].set(params["lanes"][i]["b"])

    # feed_list[2]: cat([t1, out2]) @ Wm2  ->  lanes @ zero-padded (3H, H)
    wm2 = params["merges"][2]["w"]
    w_m2 = jnp.zeros((L * H, H), f32)
    w_m2 = w_m2.at[H:2 * H, :].set(wm2[:H])          # t1 part
    w_m2 = w_m2.at[2 * H:3 * H, :].set(wm2[H:])      # out2 part
    b_m2 = params["merges"][2]["b"].reshape(1, H)

    # feed_list[1]: cat([t0, m2]) @ Wm1  ->  lanes @ w_m1a + m2 @ w_m1b
    wm1 = params["merges"][1]["w"]
    w_m1a = jnp.zeros((L * H, H), f32)
    w_m1a = w_m1a.at[0:H, :].set(wm1[:H])            # t0 part
    w_m1b = wm1[H:]                                   # (H, H) acts on m2
    b_m1 = params["merges"][1]["b"].reshape(1, H)

    # 4 deepnets batched along N, order [r1, den0, den1, den2]
    dnets = [params["r1_dnet"]] + list(params["dens"])
    w_d0 = jnp.concatenate([d[0]["w"] for d in dnets], axis=1)            # (T*H, 4H)
    b_d0 = jnp.concatenate([d[0]["b"] for d in dnets]).reshape(1, n4)
    w_dh_list, b_dh_list = [], []
    for k in range(1, 4):
        blk = jnp.zeros((n4, n4), f32)
        bb = jnp.zeros((1, n4), f32)
        for j, d in enumerate(dnets):
            blk = blk.at[j * H:(j + 1) * H, j * H:(j + 1) * H].set(d[k]["w"])
            bb = bb.at[0, j * H:(j + 1) * H].set(d[k]["b"])
        w_dh_list.append(blk)
        b_dh_list.append(bb)
    w_dh = jnp.stack(w_dh_list)                                           # (3, 4H, 4H)
    b_dh = jnp.stack(b_dh_list)                                           # (3, 1, 4H)
    w_dl = jnp.zeros((n4, n4), f32)
    b_dl = jnp.zeros((1, n4), f32)
    for j, d in enumerate(dnets):
        w_dl = w_dl.at[j * H:(j + 1) * H, j * H:(j + 1) * H].set(d[4]["w"])
        b_dl = b_dl.at[0, j * H:(j + 1) * H].set(d[4]["b"])

    # heads: cat([tmp, den_i, out_flat]) @ W_i split into packed, lane-padded weights
    w_hd = jnp.zeros((n4, pad_n), f32)        # multiplies d = [tmp|den0|den1|den2]
    w_hf = jnp.zeros((T * H, pad_n), f32)     # multiplies out_flat
    b_h = jnp.zeros((1, pad_n), f32)
    for i in range(L):
        W = params["lin_outs"][i]["w"]        # (2H + T*H, OUT)
        b = params["lin_outs"][i]["b"]
        c0 = i * OUT
        w_hd = w_hd.at[0:H, c0:c0 + OUT].set(W[0:H])                       # tmp
        w_hd = w_hd.at[(i + 1) * H:(i + 2) * H, c0:c0 + OUT].set(W[H:2 * H])  # den_i
        w_hf = w_hf.at[:, c0:c0 + OUT].set(W[2 * H:])                      # out_flat
        b_h = b_h.at[0, c0:c0 + OUT].set(b)

    return dict(w_lane=w_lane, b_lane=b_lane, w_m2=w_m2, b_m2=b_m2,
                w_m1a=w_m1a, w_m1b=w_m1b, b_m1=b_m1,
                w_d0=w_d0, b_d0=b_d0, w_dh=w_dh, b_dh=b_dh,
                w_dl=w_dl, b_dl=b_dl, w_hd=w_hd, w_hf=w_hf, b_h=b_h)


# ------------------------------- forward ----------------------------------- #
def grunet_forward(packed, x, y, z, h, *, hidden, output_dim, lanes, pad_n=PAD_N):
    bs, T, d_in = x.shape
    H = hidden

    def to_tb(a):   # (bs, T, F) -> (T*bs, F), row index = t*bs + b
        return jnp.transpose(a, (1, 0, 2)).reshape(T * bs, d_in)

    xyz = jnp.concatenate([to_tb(x), to_tb(y), to_tb(z)], axis=1)   # (T*bs, 3*IN)

    args = (xyz,
            packed["w_lane"], packed["b_lane"],
            packed["w_m2"], packed["b_m2"],
            packed["w_m1a"], packed["w_m1b"], packed["b_m1"],
            packed["w_d0"], packed["b_d0"],
            packed["w_dh"], packed["b_dh"],
            packed["w_dl"], packed["b_dl"],
            packed["w_hd"], packed["w_hf"], packed["b_h"])

    vmem = pl.BlockSpec(memory_space=pltpu.MemorySpace.VMEM)
    slab = pl.pallas_call(
        functools.partial(_grunet_fused_kernel, T=T, bs=bs, H=H),
        out_shape=jax.ShapeDtypeStruct((bs, pad_n), jnp.float32),
        in_specs=[vmem] * len(args),
        out_specs=vmem,
    )(*args)

    o = tuple(slab[:, i * output_dim:(i + 1) * output_dim] for i in range(lanes))
    return o[0], o[1], o[2], h


# --------------------- pure-JAX (unfused) reference ------------------------ #
def _linear_ref(p, v, leaky):
    o = v @ p["w"] + p["b"]
    return jnp.where(o >= 0, o, LEAKY_SLOPE * o) if leaky else o


def reference_forward(params, x, y, z, h, *, hidden):
    bs, T, d_in = x.shape
    H = hidden

    def lane(p, inp):
        return _linear_ref(p, inp.reshape(bs * T, d_in), True).reshape(bs, T, H)

    def merge(p, a, b_):
        cat = jnp.concatenate([a, b_], axis=-1).reshape(bs * T, 2 * H)
        return _linear_ref(p, cat, True).reshape(bs, T, H)

    def deepnet(layers, inp):
        o = inp
        for i, p in enumerate(layers):
            o = _linear_ref(p, o, i < len(layers) - 1)
        return o

    out = lane(params["lanes"][2], z)
    t1 = lane(params["lanes"][1], y)
    t0 = lane(params["lanes"][0], x)
    out = merge(params["merges"][2], t1, out)
    out = merge(params["merges"][1], t0, out)
    out_flat = out.reshape(bs, T * H)
    tmp = deepnet(params["r1_dnet"], out_flat)
    heads = []
    for i in range(3):
        cat = jnp.concatenate([tmp, deepnet(params["dens"][i], out_flat), out_flat], axis=1)
        heads.append(_linear_ref(params["lin_outs"][i], cat, False))
    return heads[0], heads[1], heads[2], h


# --------------------------------- main ------------------------------------ #
if __name__ == "__main__":
    BATCH = 8            # fills all 8 sublanes of the output vregs
    BACKWARDS = 8        # sequence length ("backwards" in the module)
    INPUTS = 4
    HIDDEN = 32
    N_LAYERS = 4
    OUTPUT_DIM = 3
    LANES = 3

    key = jax.random.PRNGKey(0)
    kp, kx, ky, kz = jax.random.split(key, 4)

    params = make_params(kp, LANES, INPUTS, BACKWARDS, HIDDEN, OUTPUT_DIM)
    packed = pack_params(params, lanes=LANES, inputs=INPUTS, backwards=BACKWARDS,
                         hidden=HIDDEN, output_dim=OUTPUT_DIM)

    x = jax.random.normal(kx, (BATCH, BACKWARDS, INPUTS), jnp.float32)
    y = jax.random.normal(ky, (BATCH, BACKWARDS, INPUTS), jnp.float32)
    z = jax.random.normal(kz, (BATCH, BACKWARDS, INPUTS), jnp.float32)
    h = jnp.zeros((N_LAYERS, BATCH, HIDDEN), jnp.float32)  # gru1 hidden, passed through

    fwd = jax.jit(functools.partial(grunet_forward, hidden=HIDDEN,
                                    output_dim=OUTPUT_DIM, lanes=LANES))
    o0, o1, o2, h_out = fwd(packed, x, y, z, h)
    jax.block_until_ready((o0, o1, o2, h_out))

    # Correctness check against the unfused pure-JAX reference.
    r0, r1, r2, _ = reference_forward(params, x, y, z, h, hidden=HIDDEN)
    for got, ref in ((o0, r0), (o1, r1), (o2, r2)):
        assert got.shape == (BATCH, OUTPUT_DIM)
        assert jnp.allclose(got, ref, atol=2e-2, rtol=2e-2), float(jnp.max(jnp.abs(got - ref)))
    assert h_out.shape == h.shape
    print("KERNEL_OK")
</pallas_src>

<mosaic_0001>
module attributes {stable_mosaic.version = 11 : i64} {
  func.func @_grunet_fused_kernel(%arg0: memref<64x12xf32, #tpu.memory_space<vmem>>, %arg1: memref<12x96xf32, #tpu.memory_space<vmem>>, %arg2: memref<1x96xf32, #tpu.memory_space<vmem>>, %arg3: memref<96x32xf32, #tpu.memory_space<vmem>>, %arg4: memref<1x32xf32, #tpu.memory_space<vmem>>, %arg5: memref<96x32xf32, #tpu.memory_space<vmem>>, %arg6: memref<32x32xf32, #tpu.memory_space<vmem>>, %arg7: memref<1x32xf32, #tpu.memory_space<vmem>>, %arg8: memref<256x128xf32, #tpu.memory_space<vmem>>, %arg9: memref<1x128xf32, #tpu.memory_space<vmem>>, %arg10: memref<3x128x128xf32, #tpu.memory_space<vmem>>, %arg11: memref<3x1x128xf32, #tpu.memory_space<vmem>>, %arg12: memref<128x128xf32, #tpu.memory_space<vmem>>, %arg13: memref<1x128xf32, #tpu.memory_space<vmem>>, %arg14: memref<128x128xf32, #tpu.memory_space<vmem>>, %arg15: memref<256x128xf32, #tpu.memory_space<vmem>>, %arg16: memref<1x128xf32, #tpu.memory_space<vmem>>, %arg17: memref<8x128xf32, #tpu.memory_space<vmem>>) attributes {dimension_semantics = [], scalar_prefetch = 0 : i64, scratch_operands = 0 : i64, tpu.core_type = #tpu.core_type<tc>} {
    %c0 = arith.constant 0 : index
    %c0_0 = arith.constant 0 : index
    %0 = vector.load %arg0[%c0, %c0_0] : memref<64x12xf32, #tpu.memory_space<vmem>>, vector<64x12xf32>
    %c0_1 = arith.constant 0 : index
    %c0_2 = arith.constant 0 : index
    %1 = vector.load %arg1[%c0_1, %c0_2] : memref<12x96xf32, #tpu.memory_space<vmem>>, vector<12x96xf32>
    %cst = arith.constant dense<0.000000e+00> : vector<64x96xf32>
    %2 = tpu.matmul %0, %1, %cst {dimension_numbers = #tpu.dot_dimension_numbers<[1], [0], [0], [1], [0, 0, 1, 1], [], []>} : vector<64x12xf32>, vector<12x96xf32>, vector<64x96xf32> -> vector<64x96xf32>
    %c0_3 = arith.constant 0 : index
    %c0_4 = arith.constant 0 : index
    %3 = vector.load %arg2[%c0_3, %c0_4] : memref<1x96xf32, #tpu.memory_space<vmem>>, vector<1x96xf32>
    %4 = vector.broadcast %3 : vector<1x96xf32> to vector<64x96xf32>
    %5 = arith.addf %2, %4 : vector<64x96xf32>
    %cst_5 = arith.constant 0.000000e+00 : f32
    %6 = vector.broadcast %cst_5 : f32 to vector<64x96xf32>
    %7 = arith.cmpf oge, %5, %6 : vector<64x96xf32>
    %cst_6 = arith.constant 0.00999999977 : f32
    %8 = vector.broadcast %cst_6 : f32 to vector<64x96xf32>
    %9 = arith.mulf %8, %5 : vector<64x96xf32>
    %10 = arith.select %7, %5, %9 : vector<64x96xi1>, vector<64x96xf32>
    %c0_7 = arith.constant 0 : index
    %c0_8 = arith.constant 0 : index
    %11 = vector.load %arg3[%c0_7, %c0_8] : memref<96x32xf32, #tpu.memory_space<vmem>>, vector<96x32xf32>
    %cst_9 = arith.constant dense<0.000000e+00> : vector<64x32xf32>
    %12 = tpu.matmul %10, %11, %cst_9 {dimension_numbers = #tpu.dot_dimension_numbers<[1], [0], [0], [1], [0, 0, 1, 1], [], []>} : vector<64x96xf32>, vector<96x32xf32>, vector<64x32xf32> -> vector<64x32xf32>
    %c0_10 = arith.constant 0 : index
    %c0_11 = arith.constant 0 : index
    %13 = vector.load %arg4[%c0_10, %c0_11] : memref<1x32xf32, #tpu.memory_space<vmem>>, vector<1x32xf32>
    %14 = vector.broadcast %13 : vector<1x32xf32> to vector<64x32xf32>
    %15 = arith.addf %12, %14 : vector<64x32xf32>
    %cst_12 = arith.constant 0.000000e+00 : f32
    %16 = vector.broadcast %cst_12 : f32 to vector<64x32xf32>
    %17 = arith.cmpf oge, %15, %16 : vector<64x32xf32>
    %cst_13 = arith.constant 0.00999999977 : f32
    %18 = vector.broadcast %cst_13 : f32 to vector<64x32xf32>
    %19 = arith.mulf %18, %15 : vector<64x32xf32>
    %20 = arith.select %17, %15, %19 : vector<64x32xi1>, vector<64x32xf32>
    %c0_14 = arith.constant 0 : index
    %c0_15 = arith.constant 0 : index
    %21 = vector.load %arg5[%c0_14, %c0_15] : memref<96x32xf32, #tpu.memory_space<vmem>>, vector<96x32xf32>
    %cst_16 = arith.constant dense<0.000000e+00> : vector<64x32xf32>
    %22 = tpu.matmul %10, %21, %cst_16 {dimension_numbers = #tpu.dot_dimension_numbers<[1], [0], [0], [1], [0, 0, 1, 1], [], []>} : vector<64x96xf32>, vector<96x32xf32>, vector<64x32xf32> -> vector<64x32xf32>
    %c0_17 = arith.constant 0 : index
    %c0_18 = arith.constant 0 : index
    %23 = vector.load %arg6[%c0_17, %c0_18] : memref<32x32xf32, #tpu.memory_space<vmem>>, vector<32x32xf32>
    %cst_19 = arith.constant dense<0.000000e+00> : vector<64x32xf32>
    %24 = tpu.matmul %20, %23, %cst_19 {dimension_numbers = #tpu.dot_dimension_numbers<[1], [0], [0], [1], [0, 0, 1, 1], [], []>} : vector<64x32xf32>, vector<32x32xf32>, vector<64x32xf32> -> vector<64x32xf32>
    %25 = arith.addf %22, %24 : vector<64x32xf32>
    %c0_20 = arith.constant 0 : index
    %c0_21 = arith.constant 0 : index
    %26 = vector.load %arg7[%c0_20, %c0_21] : memref<1x32xf32, #tpu.memory_space<vmem>>, vector<1x32xf32>
    %27 = vector.broadcast %26 : vector<1x32xf32> to vector<64x32xf32>
    %28 = arith.addf %25, %27 : vector<64x32xf32>
    %cst_22 = arith.constant 0.000000e+00 : f32
    %29 = vector.broadcast %cst_22 : f32 to vector<64x32xf32>
    %30 = arith.cmpf oge, %28, %29 : vector<64x32xf32>
    %cst_23 = arith.constant 0.00999999977 : f32
    %31 = vector.broadcast %cst_23 : f32 to vector<64x32xf32>
    %32 = arith.mulf %31, %28 : vector<64x32xf32>
    %33 = arith.select %30, %28, %32 : vector<64x32xi1>, vector<64x32xf32>
    %cst_24 = arith.constant 0.000000e+00 : f32
    %34 = vector.broadcast %cst_24 : f32 to vector<8x128xf32>
    %cst_25 = arith.constant 0.000000e+00 : f32
    %35 = vector.broadcast %cst_25 : f32 to vector<8x128xf32>
    %36 = vector.extract_strided_slice %33 {offsets = [0, 0], sizes = [8, 32], strides = [1, 1]} : vector<64x32xf32> to vector<8x32xf32>
    %c0_26 = arith.constant 0 : index
    %c0_27 = arith.constant 0 : index
    %37 = vector.load %arg8[%c0_26, %c0_27] : memref<256x128xf32, #tpu.memory_space<vmem>>, vector<32x128xf32>
    %cst_28 = arith.constant dense<0.000000e+00> : vector<8x128xf32>
    %38 = tpu.matmul %36, %37, %cst_28 {dimension_numbers = #tpu.dot_dimension_numbers<[1], [0], [0], [1], [0, 0, 1, 1], [], []>} : vector<8x32xf32>, vector<32x128xf32>, vector<8x128xf32> -> vector<8x128xf32>
    %39 = arith.addf %34, %38 : vector<8x128xf32>
    %c0_29 = arith.constant 0 : index
    %c0_30 = arith.constant 0 : index
    %40 = vector.load %arg15[%c0_29, %c0_30] : memref<256x128xf32, #tpu.memory_space<vmem>>, vector<32x128xf32>
    %cst_31 = arith.constant dense<0.000000e+00> : vector<8x128xf32>
    %41 = tpu.matmul %36, %40, %cst_31 {dimension_numbers = #tpu.dot_dimension_numbers<[1], [0], [0], [1], [0, 0, 1, 1], [], []>} : vector<8x32xf32>, vector<32x128xf32>, vector<8x128xf32> -> vector<8x128xf32>
    %42 = arith.addf %35, %41 : vector<8x128xf32>
    %43 = vector.extract_strided_slice %33 {offsets = [8, 0], sizes = [8, 32], strides = [1, 1]} : vector<64x32xf32> to vector<8x32xf32>
    %c32 = arith.constant 32 : index
    %c0_32 = arith.constant 0 : index
    %44 = vector.load %arg8[%c32, %c0_32] : memref<256x128xf32, #tpu.memory_space<vmem>>, vector<32x128xf32>
    %cst_33 = arith.constant dense<0.000000e+00> : vector<8x128xf32>
    %45 = tpu.matmul %43, %44, %cst_33 {dimension_numbers = #tpu.dot_dimension_numbers<[1], [0], [0], [1], [0, 0, 1, 1], [], []>} : vector<8x32xf32>, vector<32x128xf32>, vector<8x128xf32> -> vector<8x128xf32>
    %46 = arith.addf %39, %45 : vector<8x128xf32>
    %c32_34 = arith.constant 32 : index
    %c0_35 = arith.constant 0 : index
    %47 = vector.load %arg15[%c32_34, %c0_35] : memref<256x128xf32, #tpu.memory_space<vmem>>, vector<32x128xf32>
    %cst_36 = arith.constant dense<0.000000e+00> : vector<8x128xf32>
    %48 = tpu.matmul %43, %47, %cst_36 {dimension_numbers = #tpu.dot_dimension_numbers<[1], [0], [0], [1], [0, 0, 1, 1], [], []>} : vector<8x32xf32>, vector<32x128xf32>, vector<8x128xf32> -> vector<8x128xf32>
    %49 = arith.addf %42, %48 : vector<8x128xf32>
    %50 = vector.extract_strided_slice %33 {offsets = [16, 0], sizes = [8, 32], strides = [1, 1]} : vector<64x32xf32> to vector<8x32xf32>
    %c64 = arith.constant 64 : index
    %c0_37 = arith.constant 0 : index
    %51 = vector.load %arg8[%c64, %c0_37] : memref<256x128xf32, #tpu.memory_space<vmem>>, vector<32x128xf32>
    %cst_38 = arith.constant dense<0.000000e+00> : vector<8x128xf32>
    %52 = tpu.matmul %50, %51, %cst_38 {dimension_numbers = #tpu.dot_dimension_numbers<[1], [0], [0], [1], [0, 0, 1, 1], [], []>} : vector<8x32xf32>, vector<32x128xf32>, vector<8x128xf32> -> vector<8x128xf32>
    %53 = arith.addf %46, %52 : vector<8x128xf32>
    %c64_39 = arith.constant 64 : index
    %c0_40 = arith.constant 0 : index
    %54 = vector.load %arg15[%c64_39, %c0_40] : memref<256x128xf32, #tpu.memory_space<vmem>>, vector<32x128xf32>
    %cst_41 = arith.constant dense<0.000000e+00> : vector<8x128xf32>
    %55 = tpu.matmul %50, %54, %cst_41 {dimension_numbers = #tpu.dot_dimension_numbers<[1], [0], [0], [1], [0, 0, 1, 1], [], []>} : vector<8x32xf32>, vector<32x128xf32>, vector<8x128xf32> -> vector<8x128xf32>
    %56 = arith.addf %49, %55 : vector<8x128xf32>
    %57 = vector.extract_strided_slice %33 {offsets = [24, 0], sizes = [8, 32], strides = [1, 1]} : vector<64x32xf32> to vector<8x32xf32>
    %c96 = arith.constant 96 : index
    %c0_42 = arith.constant 0 : index
    %58 = vector.load %arg8[%c96, %c0_42] : memref<256x128xf32, #tpu.memory_space<vmem>>, vector<32x128xf32>
    %cst_43 = arith.constant dense<0.000000e+00> : vector<8x128xf32>
    %59 = tpu.matmul %57, %58, %cst_43 {dimension_numbers = #tpu.dot_dimension_numbers<[1], [0], [0], [1], [0, 0, 1, 1], [], []>} : vector<8x32xf32>, vector<32x128xf32>, vector<8x128xf32> -> vector<8x128xf32>
    %60 = arith.addf %53, %59 : vector<8x128xf32>
    %c96_44 = arith.constant 96 : index
    %c0_45 = arith.constant 0 : index
    %61 = vector.load %arg15[%c96_44, %c0_45] : memref<256x128xf32, #tpu.memory_space<vmem>>, vector<32x128xf32>
    %cst_46 = arith.constant dense<0.000000e+00> : vector<8x128xf32>
    %62 = tpu.matmul %57, %61, %cst_46 {dimension_numbers = #tpu.dot_dimension_numbers<[1], [0], [0], [1], [0, 0, 1, 1], [], []>} : vector<8x32xf32>, vector<32x128xf32>, vector<8x128xf32> -> vector<8x128xf32>
    %63 = arith.addf %56, %62 : vector<8x128xf32>
    %64 = vector.extract_strided_slice %33 {offsets = [32, 0], sizes = [8, 32], strides = [1, 1]} : vector<64x32xf32> to vector<8x32xf32>
    %c128 = arith.constant 128 : index
    %c0_47 = arith.constant 0 : index
    %65 = vector.load %arg8[%c128, %c0_47] : memref<256x128xf32, #tpu.memory_space<vmem>>, vector<32x128xf32>
    %cst_48 = arith.constant dense<0.000000e+00> : vector<8x128xf32>
    %66 = tpu.matmul %64, %65, %cst_48 {dimension_numbers = #tpu.dot_dimension_numbers<[1], [0], [0], [1], [0, 0, 1, 1], [], []>} : vector<8x32xf32>, vector<32x128xf32>, vector<8x128xf32> -> vector<8x128xf32>
    %67 = arith.addf %60, %66 : vector<8x128xf32>
    %c128_49 = arith.constant 128 : index
    %c0_50 = arith.constant 0 : index
    %68 = vector.load %arg15[%c128_49, %c0_50] : memref<256x128xf32, #tpu.memory_space<vmem>>, vector<32x128xf32>
    %cst_51 = arith.constant dense<0.000000e+00> : vector<8x128xf32>
    %69 = tpu.matmul %64, %68, %cst_51 {dimension_numbers = #tpu.dot_dimension_numbers<[1], [0], [0], [1], [0, 0, 1, 1], [], []>} : vector<8x32xf32>, vector<32x128xf32>, vector<8x128xf32> -> vector<8x128xf32>
    %70 = arith.addf %63, %69 : vector<8x128xf32>
    %71 = vector.extract_strided_slice %33 {offsets = [40, 0], sizes = [8, 32], strides = [1, 1]} : vector<64x32xf32> to vector<8x32xf32>
    %c160 = arith.constant 160 : index
    %c0_52 = arith.constant 0 : index
    %72 = vector.load %arg8[%c160, %c0_52] : memref<256x128xf32, #tpu.memory_space<vmem>>, vector<32x128xf32>
    %cst_53 = arith.constant dense<0.000000e+00> : vector<8x128xf32>
    %73 = tpu.matmul %71, %72, %cst_53 {dimension_numbers = #tpu.dot_dimension_numbers<[1], [0], [0], [1], [0, 0, 1, 1], [], []>} : vector<8x32xf32>, vector<32x128xf32>, vector<8x128xf32> -> vector<8x128xf32>
    %74 = arith.addf %67, %73 : vector<8x128xf32>
    %c160_54 = arith.constant 160 : index
    %c0_55 = arith.constant 0 : index
    %75 = vector.load %arg15[%c160_54, %c0_55] : memref<256x128xf32, #tpu.memory_space<vmem>>, vector<32x128xf32>
    %cst_56 = arith.constant dense<0.000000e+00> : vector<8x128xf32>
    %76 = tpu.matmul %71, %75, %cst_56 {dimension_numbers = #tpu.dot_dimension_numbers<[1], [0], [0], [1], [0, 0, 1, 1], [], []>} : vector<8x32xf32>, vector<32x128xf32>, vector<8x128xf32> -> vector<8x128xf32>
    %77 = arith.addf %70, %76 : vector<8x128xf32>
    %78 = vector.extract_strided_slice %33 {offsets = [48, 0], sizes = [8, 32], strides = [1, 1]} : vector<64x32xf32> to vector<8x32xf32>
    %c192 = arith.constant 192 : index
    %c0_57 = arith.constant 0 : index
    %79 = vector.load %arg8[%c192, %c0_57] : memref<256x128xf32, #tpu.memory_space<vmem>>, vector<32x128xf32>
    %cst_58 = arith.constant dense<0.000000e+00> : vector<8x128xf32>
    %80 = tpu.matmul %78, %79, %cst_58 {dimension_numbers = #tpu.dot_dimension_numbers<[1], [0], [0], [1], [0, 0, 1, 1], [], []>} : vector<8x32xf32>, vector<32x128xf32>, vector<8x128xf32> -> vector<8x128xf32>
    %81 = arith.addf %74, %80 : vector<8x128xf32>
    %c192_59 = arith.constant 192 : index
    %c0_60 = arith.constant 0 : index
    %82 = vector.load %arg15[%c192_59, %c0_60] : memref<256x128xf32, #tpu.memory_space<vmem>>, vector<32x128xf32>
    %cst_61 = arith.constant dense<0.000000e+00> : vector<8x128xf32>
    %83 = tpu.matmul %78, %82, %cst_61 {dimension_numbers = #tpu.dot_dimension_numbers<[1], [0], [0], [1], [0, 0, 1, 1], [], []>} : vector<8x32xf32>, vector<32x128xf32>, vector<8x128xf32> -> vector<8x128xf32>
    %84 = arith.addf %77, %83 : vector<8x128xf32>
    %85 = vector.extract_strided_slice %33 {offsets = [56, 0], sizes = [8, 32], strides = [1, 1]} : vector<64x32xf32> to vector<8x32xf32>
    %c224 = arith.constant 224 : index
    %c0_62 = arith.constant 0 : index
    %86 = vector.load %arg8[%c224, %c0_62] : memref<256x128xf32, #tpu.memory_space<vmem>>, vector<32x128xf32>
    %cst_63 = arith.constant dense<0.000000e+00> : vector<8x128xf32>
    %87 = tpu.matmul %85, %86, %cst_63 {dimension_numbers = #tpu.dot_dimension_numbers<[1], [0], [0], [1], [0, 0, 1, 1], [], []>} : vector<8x32xf32>, vector<32x128xf32>, vector<8x128xf32> -> vector<8x128xf32>
    %88 = arith.addf %81, %87 : vector<8x128xf32>
    %c224_64 = arith.constant 224 : index
    %c0_65 = arith.constant 0 : index
    %89 = vector.load %arg15[%c224_64, %c0_65] : memref<256x128xf32, #tpu.memory_space<vmem>>, vector<32x128xf32>
    %cst_66 = arith.constant dense<0.000000e+00> : vector<8x128xf32>
    %90 = tpu.matmul %85, %89, %cst_66 {dimension_numbers = #tpu.dot_dimension_numbers<[1], [0], [0], [1], [0, 0, 1, 1], [], []>} : vector<8x32xf32>, vector<32x128xf32>, vector<8x128xf32> -> vector<8x128xf32>
    %91 = arith.addf %84, %90 : vector<8x128xf32>
    %c0_67 = arith.constant 0 : index
    %c0_68 = arith.constant 0 : index
    %92 = vector.load %arg9[%c0_67, %c0_68] : memref<1x128xf32, #tpu.memory_space<vmem>>, vector<1x128xf32>
    %93 = vector.broadcast %92 : vector<1x128xf32> to vector<8x128xf32>
    %94 = arith.addf %88, %93 : vector<8x128xf32>
    %cst_69 = arith.constant 0.000000e+00 : f32
    %95 = vector.broadcast %cst_69 : f32 to vector<8x128xf32>
    %96 = arith.cmpf oge, %94, %95 : vector<8x128xf32>
    %cst_70 = arith.constant 0.00999999977 : f32
    %97 = vector.broadcast %cst_70 : f32 to vector<8x128xf32>
    %98 = arith.mulf %97, %94 : vector<8x128xf32>
    %99 = arith.select %96, %94, %98 : vector<8x128xi1>, vector<8x128xf32>
    %c0_71 = arith.constant 0 : index
    %c0_72 = arith.constant 0 : index
    %c0_73 = arith.constant 0 : index
    %100 = vector.load %arg10[%c0_71, %c0_72, %c0_73] : memref<3x128x128xf32, #tpu.memory_space<vmem>>, vector<1x128x128xf32>
    %101 = vector.shape_cast %100 : vector<1x128x128xf32> to vector<128x128xf32>
    %cst_74 = arith.constant dense<0.000000e+00> : vector<8x128xf32>
    %102 = tpu.matmul %99, %101, %cst_74 {dimension_numbers = #tpu.dot_dimension_numbers<[1], [0], [0], [1], [0, 0, 1, 1], [], []>} : vector<8x128xf32>, vector<128x128xf32>, vector<8x128xf32> -> vector<8x128xf32>
    %c0_75 = arith.constant 0 : index
    %c0_76 = arith.constant 0 : index
    %c0_77 = arith.constant 0 : index
    %103 = vector.load %arg11[%c0_75, %c0_76, %c0_77] : memref<3x1x128xf32, #tpu.memory_space<vmem>>, vector<1x1x128xf32>
    %104 = vector.shape_cast %103 : vector<1x1x128xf32> to vector<1x128xf32>
    %105 = vector.broadcast %104 : vector<1x128xf32> to vector<8x128xf32>
    %106 = arith.addf %102, %105 : vector<8x128xf32>
    %cst_78 = arith.constant 0.000000e+00 : f32
    %107 = vector.broadcast %cst_78 : f32 to vector<8x128xf32>
    %108 = arith.cmpf oge, %106, %107 : vector<8x128xf32>
    %cst_79 = arith.constant 0.00999999977 : f32
    %109 = vector.broadcast %cst_79 : f32 to vector<8x128xf32>
    %110 = arith.mulf %109, %106 : vector<8x128xf32>
    %111 = arith.select %108, %106, %110 : vector<8x128xi1>, vector<8x128xf32>
    %c1 = arith.constant 1 : index
    %c0_80 = arith.constant 0 : index
    %c0_81 = arith.constant 0 : index
    %112 = vector.load %arg10[%c1, %c0_80, %c0_81] : memref<3x128x128xf32, #tpu.memory_space<vmem>>, vector<1x128x128xf32>
    %113 = vector.shape_cast %112 : vector<1x128x128xf32> to vector<128x128xf32>
    %cst_82 = arith.constant dense<0.000000e+00> : vector<8x128xf32>
    %114 = tpu.matmul %111, %113, %cst_82 {dimension_numbers = #tpu.dot_dimension_numbers<[1], [0], [0], [1], [0, 0, 1, 1], [], []>} : vector<8x128xf32>, vector<128x128xf32>, vector<8x128xf32> -> vector<8x128xf32>
    %c1_83 = arith.constant 1 : index
    %c0_84 = arith.constant 0 : index
    %c0_85 = arith.constant 0 : index
    %115 = vector.load %arg11[%c1_83, %c0_84, %c0_85] : memref<3x1x128xf32, #tpu.memory_space<vmem>>, vector<1x1x128xf32>
    %116 = vector.shape_cast %115 : vector<1x1x128xf32> to vector<1x128xf32>
    %117 = vector.broadcast %116 : vector<1x128xf32> to vector<8x128xf32>
    %118 = arith.addf %114, %117 : vector<8x128xf32>
    %cst_86 = arith.constant 0.000000e+00 : f32
    %119 = vector.broadcast %cst_86 : f32 to vector<8x128xf32>
    %120 = arith.cmpf oge, %118, %119 : vector<8x128xf32>
    %cst_87 = arith.constant 0.00999999977 : f32
    %121 = vector.broadcast %cst_87 : f32 to vector<8x128xf32>
    %122 = arith.mulf %121, %118 : vector<8x128xf32>
    %123 = arith.select %120, %118, %122 : vector<8x128xi1>, vector<8x128xf32>
    %c2 = arith.constant 2 : index
    %c0_88 = arith.constant 0 : index
    %c0_89 = arith.constant 0 : index
    %124 = vector.load %arg10[%c2, %c0_88, %c0_89] : memref<3x128x128xf32, #tpu.memory_space<vmem>>, vector<1x128x128xf32>
    %125 = vector.shape_cast %124 : vector<1x128x128xf32> to vector<128x128xf32>
    %cst_90 = arith.constant dense<0.000000e+00> : vector<8x128xf32>
    %126 = tpu.matmul %123, %125, %cst_90 {dimension_numbers = #tpu.dot_dimension_numbers<[1], [0], [0], [1], [0, 0, 1, 1], [], []>} : vector<8x128xf32>, vector<128x128xf32>, vector<8x128xf32> -> vector<8x128xf32>
    %c2_91 = arith.constant 2 : index
    %c0_92 = arith.constant 0 : index
    %c0_93 = arith.constant 0 : index
    %127 = vector.load %arg11[%c2_91, %c0_92, %c0_93] : memref<3x1x128xf32, #tpu.memory_space<vmem>>, vector<1x1x128xf32>
    %128 = vector.shape_cast %127 : vector<1x1x128xf32> to vector<1x128xf32>
    %129 = vector.broadcast %128 : vector<1x128xf32> to vector<8x128xf32>
    %130 = arith.addf %126, %129 : vector<8x128xf32>
    %cst_94 = arith.constant 0.000000e+00 : f32
    %131 = vector.broadcast %cst_94 : f32 to vector<8x128xf32>
    %132 = arith.cmpf oge, %130, %131 : vector<8x128xf32>
    %cst_95 = arith.constant 0.00999999977 : f32
    %133 = vector.broadcast %cst_95 : f32 to vector<8x128xf32>
    %134 = arith.mulf %133, %130 : vector<8x128xf32>
    %135 = arith.select %132, %130, %134 : vector<8x128xi1>, vector<8x128xf32>
    %c0_96 = arith.constant 0 : index
    %c0_97 = arith.constant 0 : index
    %136 = vector.load %arg12[%c0_96, %c0_97] : memref<128x128xf32, #tpu.memory_space<vmem>>, vector<128x128xf32>
    %cst_98 = arith.constant dense<0.000000e+00> : vector<8x128xf32>
    %137 = tpu.matmul %135, %136, %cst_98 {dimension_numbers = #tpu.dot_dimension_numbers<[1], [0], [0], [1], [0, 0, 1, 1], [], []>} : vector<8x128xf32>, vector<128x128xf32>, vector<8x128xf32> -> vector<8x128xf32>
    %c0_99 = arith.constant 0 : index
    %c0_100 = arith.constant 0 : index
    %138 = vector.load %arg13[%c0_99, %c0_100] : memref<1x128xf32, #tpu.memory_space<vmem>>, vector<1x128xf32>
    %139 = vector.broadcast %138 : vector<1x128xf32> to vector<8x128xf32>
    %140 = arith.addf %137, %139 : vector<8x128xf32>
    %c0_101 = arith.constant 0 : index
    %c0_102 = arith.constant 0 : index
    %141 = vector.load %arg14[%c0_101, %c0_102] : memref<128x128xf32, #tpu.memory_space<vmem>>, vector<128x128xf32>
    %cst_103 = arith.constant dense<0.000000e+00> : vector<8x128xf32>
    %142 = tpu.matmul %140, %141, %cst_103 {dimension_numbers = #tpu.dot_dimension_numbers<[1], [0], [0], [1], [0, 0, 1, 1], [], []>} : vector<8x128xf32>, vector<128x128xf32>, vector<8x128xf32> -> vector<8x128xf32>
    %143 = arith.addf %142, %91 : vector<8x128xf32>
    %c0_104 = arith.constant 0 : index
    %c0_105 = arith.constant 0 : index
    %144 = vector.load %arg16[%c0_104, %c0_105] : memref<1x128xf32, #tpu.memory_space<vmem>>, vector<1x128xf32>
    %145 = vector.broadcast %144 : vector<1x128xf32> to vector<8x128xf32>
    %146 = arith.addf %143, %145 : vector<8x128xf32>
    %c0_106 = arith.constant 0 : index
    %c0_107 = arith.constant 0 : index
    %147 = vector.load %arg17[%c0_106, %c0_107] : memref<8x128xf32, #tpu.memory_space<vmem>>, vector<8x128xf32>
    tpu.vector_store %arg17[%c0_106, %c0_107], %146 {strides = array<i32>} : memref<8x128xf32, #tpu.memory_space<vmem>>, vector<8x128xf32>,
    return
  }
}

</mosaic_0001>

<bundles_post_ra>
// kernel: grunet_forward.1
= control target key start
LH: loop header
LB: loop body
LE: loop exit
PB: predicated region body
PF: predicated region fallthrough
CT: control target
= control target key end

     0   :  { %s1676_s0 = inlined_call_operand.vmem [shape: f32[64,12], index: 0, kind: input, shape index: {}]   ;;  %s1677_s1 = inlined_call_operand.vmem [shape: f32[12,96], index: 1, kind: input, shape index: {}]   ;;  %s1678_s2 = inlined_call_operand.vmem [shape: f32[1,96], index: 2, kind: input, shape index: {}]   ;;  %s1679_s3 = inlined_call_operand.vmem [shape: f32[96,32], index: 3, kind: input, shape index: {}]   ;;  %s1680_s4 = inlined_call_operand.vmem [shape: f32[1,32], index: 4, kind: input, shape index: {}]   ;;  %s1681_s5 = inlined_call_operand.vmem [shape: f32[96,32], index: 5, kind: input, shape index: {}]   ;;  %s1682_s6 = inlined_call_operand.vmem [shape: f32[32,32], index: 6, kind: input, shape index: {}]   ;;  %s1683_s7 = inlined_call_operand.vmem [shape: f32[1,32], index: 7, kind: input, shape index: {}]   ;;  %s1684_s8 = inlined_call_operand.hbm [shape: f32[256,128], index: 8, kind: input, shape index: {}]   ;;  %s1685_s9 = inlined_call_operand.vmem [shape: f32[1,128], index: 9, kind: input, shape index: {}]   ;;  %s1686_s10 = inlined_call_operand.hbm [shape: f32[3,128,128], index: 10, kind: input, shape index: {}]   ;;  %s1687_s11 = inlined_call_operand.vmem [shape: f32[3,1,128], index: 11, kind: input, shape index: {}]   ;;  %s1688_s12 = inlined_call_operand.vmem [shape: f32[128,128], index: 12, kind: input, shape index: {}]   ;;  %s1689_s13 = inlined_call_operand.vmem [shape: f32[1,128], index: 13, kind: input, shape index: {}]   ;;  %s1690_s14 = inlined_call_operand.vmem [shape: f32[128,128], index: 14, kind: input, shape index: {}]   ;;  %s1691_s15 = inlined_call_operand.hbm [shape: f32[256,128], index: 15, kind: input, shape index: {}]   ;;  %s1692_s16 = inlined_call_operand.vmem [shape: f32[1,128], index: 16, kind: input, shape index: {}]   ;;  %s1693_s17 = inlined_call_operand.vmem [shape: f32[8,128], index: 17, kind: output, shape index: {}]  }
   0x1   :  { %1696 = sst [smem:[#allocation9_spill]] %s1676_s0 }
   0x2   :  { %1697 = sst [smem:[#allocation10_spill]] %s1677_s1 }
   0x3   :  { %22 = vsyncpa [#allocation3], 0 }
   0x4   :  { %23 = vsyncpa [#allocation5], 0  ;;  %s59_s26 = sshll.u32 %s1686_s10, 4  ;;  %s1268_s27 = smov [#allocation4]   ;;  %s60_s26 = int_to_ptr.hbm [resolvable:$true] %s59_s26 }
   0x5   :  { %s61_s28 = sshll.u32 %s1268_s27, 4  ;;  %s44_s30 = sshll.u32 %s1684_s8, 4  ;;  %s62_s28 = int_to_ptr.vmem [resolvable:$true] %s61_s28  ;;  %s45_s30 = int_to_ptr.hbm [resolvable:$true] %s44_s30 }
   0x6   :  { %s1269_s18 = smov 128   ;;  %s1270_s19 = smov 8  }
   0x7   :  { %67 = dma.hbm_to_vmem [thread:$0]  %s60_s26, 6144, %s62_s28, [#allocation5], %s1269_s18, %s1269_s18, %s1270_s19  }
   0x8   :  { %s1271_s1 = smov [#allocation2]   ;;  %s80_s23 = sshll.u32 %s1691_s15, 4  ;;  %s81_s23 = int_to_ptr.hbm [resolvable:$true] %s80_s23 }
   0x9   :  { %s46_s20 = sshll.u32 %s1271_s1, 4  ;;  %s1272_s10 = smov [#allocation6]   ;;  %s47_s20 = int_to_ptr.vmem [resolvable:$true] %s46_s20 }
   0xa   :  { %52 = dma.hbm_to_vmem [thread:$0]  %s45_s30, 4096, %s47_s20, [#allocation3], %s1269_s18, %s1269_s18, %s1270_s19  }
   0xb   :  { %s82_s24 = sshll.u32 %s1272_s10, 4  ;;  %s83_s24 = int_to_ptr.vmem [resolvable:$true] %s82_s24 }
   0xc   :  { %88 = dma.hbm_to_vmem [thread:$0]  %s81_s23, 4096, %s83_s24, [#allocation5], %s1269_s18, %s1269_s18, %s1270_s19  }
   0xd   :  { %1264 = dma.done.wait [#allocation3], 4096  }
   0xe   :  { %1265 = vsyncadd [#allocation3], 4294963200 }
   0xf   :  { %1266 = dma.done.wait [#allocation5], 10240  }
  0x10   :  { %1267 = vsyncadd [#allocation5], 4294957056  ;;  %vm142_vm0 = vcmask 1043456   ;;  %s1698_s26 = sld [smem:[#allocation10_spill]]  ;;  %vm117_vm1 = vcmask 97280   ;;  %v222_v4 = vld [vmem:[%s1679_s3 + $0x58] sm:$0xff] }
  0x11   :  { %s1699_s0 = sld [smem:[#allocation9_spill]]  ;;  %v328_v5 = vld [vmem:[%s1681_s5 + $0x58] sm:$0xff]  ;;  %v221_v6 = vld [vmem:[%s1679_s3 + $0x50] sm:$0xff]  ;;  %v220_v8 = vld [vmem:[%s1679_s3 + $0x48] sm:$0xff]  ;;  %vm227_vm3 = vcmask 785408   ;;  %vm333_vm12 = vcmask 261120  }
  0x12   :  { %403 = vmatpush.msra.mxu3 %v328_v5  ;;  %v327_v7 = vld [vmem:[%s1681_s5 + $0x50] sm:$0xff]  ;;  %v326_v9 = vld [vmem:[%s1681_s5 + $0x48] sm:$0xff]  ;;  %v219_v11 = vld [vmem:[%s1679_s3 + $0x40] sm:$0xff] }
  0x13   :  { %v325_v13 = vld [vmem:[%s1681_s5 + $0x40] sm:$0xff]  ;;  %v218_v14 = vld [vmem:[%s1679_s3 + $0x38] sm:$0xff]  ;;  %v217_v16 = vld [vmem:[%s1679_s3 + $0x30] sm:$0xff] }
  0x14   :  { %404 = vmatpush.msra.mxu3 %v327_v7  ;;  %v324_v15 = vld [vmem:[%s1681_s5 + $0x38] sm:$0xff]  ;;  %v323_v17 = vld [vmem:[%s1681_s5 + $0x30] sm:$0xff]  ;;  %v216_v18 = vld [vmem:[%s1679_s3 + $0x28] sm:$0xff] }
  0x15   :  { %v322_v19 = vld [vmem:[%s1681_s5 + $0x28] sm:$0xff]  ;;  %v215_v21 = vld [vmem:[%s1679_s3 + $0x20] sm:$0xff]  ;;  %v214_v24 = vld [vmem:[%s1679_s3 + $0x18] sm:$0xff] }
  0x16   :  { %v112_v0 = vld [vmem:[%s1698_s26 + $0x8] sm:$0xf]  ;;  %v111_v1 = vld [vmem:[%s1698_s26] sm:$0xff]  ;;  %405 = vmatpush.msra.mxu3 %v326_v9  ;;  %v320_v25 = vld [vmem:[%s1681_s5 + $0x18] sm:$0xff] }
  0x17   :  { %1125 = vmatpush.msk.msra.mxu0 %vm142_vm0, %v112_v0  ;;  %v103_v2 = vld [vmem:[%s1699_s0] sm:$0xff]  ;;  %1176 = vmatpush.msk.msra.mxu1 %vm142_vm0, %v112_v0  ;;  %v108_v3 = vld [vmem:[%s1699_s0 + $0x28] sm:$0xff]  ;;  %v109_v12 = vld [vmem:[%s1699_s0 + $0x30] sm:$0xff] }
  0x18   :  { %v104_v10 = vld [vmem:[%s1699_s0 + $0x8] sm:$0xff]  ;;  %406 = vmatpush.msra.mxu3 %v325_v13  ;;  %v105_v20 = vld [vmem:[%s1699_s0 + $0x10] sm:$0xff]  ;;  %v110_v22 = vld [vmem:[%s1699_s0 + $0x38] sm:$0xff] }
  0x19   :  { %161 = vmatpush.msra.mxu0 %v111_v1  ;;  %1177 = vmatpush.msra.mxu1 %v111_v1  ;;  %v321_v23 = vld [vmem:[%s1681_s5 + $0x20] sm:$0xff]  ;;  %v106_v26 = vld [vmem:[%s1699_s0 + $0x18] sm:$0xff]  ;;  %v213_v28 = vld [vmem:[%s1679_s3 + $0x10] sm:$0xff] }
  0x1a   :  { %1126 = vmatmul.msk.f32.vlgmr.msra.gmra.mxu0 %vm117_vm1, %v103_v2  ;;  %1131 = vmatmul.msk.f32.vlgmr.msra.gmra.mxu1 %vm117_vm1, %v108_v3  ;;  %v107_v27 = vld [vmem:[%s1699_s0 + $0x20] sm:$0xff]  ;;  %v319_v29 = vld [vmem:[%s1681_s5 + $0x10] sm:$0xff]  ;;  %v212_v30 = vld [vmem:[%s1679_s3 + $0x8] sm:$0xff] }
  0x1b   :  { %256 = vmatpush.msrb.mxu1 %v222_v4  ;;  %407 = vmatpush.msra.mxu3 %v324_v15  ;;  %v318_v31 = vld [vmem:[%s1681_s5 + $0x8] sm:$0xff]  ;;  %v211_v32 = vld [vmem:[%s1679_s3] sm:$0xff]  ;;  %v332_v52 = vld [vmem:[%s1682_s6 + $0x18] sm:$0xff] }
  0x1c   :  { %v317_v33 = vld [vmem:[%s1681_s5] sm:$0xff]  ;;  %370 = vmatpush.msra.mxu2 %v332_v52  ;;  %v331_v4 = vld [vmem:[%s1682_s6 + $0x10] sm:$0xff]  ;;  %v330_v5 = vld [vmem:[%s1682_s6 + $0x8] sm:$0xff] }
  0x1d   :  { %257 = vmatpush.msrb.mxu1 %v221_v6  ;;  %408 = vmatpush.msra.mxu3 %v323_v17  ;;  %v1183_v34 = vld [vmem:[%s1678_s2] ss:$0 sm:$0xff]  ;;  %v537_v52 = vld [vmem:[#allocation6 + $0x38] sm:$0xff] }
  0x1e   :  { %371 = vmatpush.msra.mxu2 %v331_v4  ;;  %v329_v6 = vld [vmem:[%s1682_s6] sm:$0xff] }
  0x1f   :  { %258 = vmatpush.msrb.mxu1 %v220_v8  ;;  %409 = vmatpush.msra.mxu3 %v322_v19  ;;  %v1184_v7 = vld [vmem:[%s1680_s4] ss:$0 sm:$0xff] }
  0x20   :  { %372 = vmatpush.msra.mxu2 %v330_v5  ;;  %v715_v5 = vld [vmem:[#allocation6 + $0x98] sm:$0xff] }
  0x21   :  { %259 = vmatpush.msrb.mxu1 %v219_v11  ;;  %410 = vmatpush.msra.mxu3 %v321_v23 }
  0x22   :  { %1127 = vmatmul.msk.f32.gmra.mxu0 %vm117_vm1, %v104_v10  ;;  %1132 = vmatmul.msk.f32.gmra.mxu1 %vm117_vm1, %v109_v12 }
  0x23   :  { %260 = vmatpush.msrb.mxu1 %v218_v14  ;;  %411 = vmatpush.msra.mxu3 %v320_v25  ;;  %v478_v25 = vld [vmem:[#allocation2 + $0x10] sm:$0xff] }
  0x24   :  { %373 = vmatpush.msra.mxu2 %v329_v6 }
  0x25   :  { %261 = vmatpush.msrb.mxu1 %v217_v16  ;;  %412 = vmatpush.msra.mxu3 %v319_v29 }
  0x27   :  { %262 = vmatpush.msrb.mxu1 %v216_v18  ;;  %413 = vmatpush.msra.mxu3 %v318_v31 }
  0x29   :  { %263 = vmatpush.msrb.mxu1 %v215_v21  ;;  %414 = vmatpush.msra.mxu3 %v317_v33 }
  0x2a   :  { %1128 = vmatmul.msk.f32.gmra.mxu0 %vm117_vm1, %v105_v20  ;;  %1133 = vmatmul.msk.f32.gmra.mxu1 %vm117_vm1, %v110_v22 }
  0x2b   :  { %264 = vmatpush.msrb.mxu1 %v214_v24  ;;  %v479_v24 = vld [vmem:[#allocation2 + $0x18] sm:$0xff] }
  0x2c   :  { %526 = vmatpush.msrb.mxu2 %v479_v24  ;;  %v581_v24 = vld [vmem:[#allocation2 + $0x58] sm:$0xff] }
  0x2d   :  { %265 = vmatpush.msrb.mxu1 %v213_v28 }
  0x2e   :  { %527 = vmatpush.msrb.mxu2 %v478_v25  ;;  %v740_v25 = vld [vmem:[#allocation2 + $0xb8] sm:$0xff] }
  0x2f   :  { %266 = vmatpush.msrb.mxu1 %v212_v30 }
  0x31   :  { %267 = vmatpush.msrb.mxu1 %v211_v32 }
  0x32   :  { %1129 = vmatmul.msk.f32.gmra.mxu0 %vm117_vm1, %v106_v26  ;;  %v487_v26 = vld [vmem:[#allocation2 + $0x38] sm:$0xff] }
  0x33   :  { %503 = vmatpush.msrb.mxu0 %v487_v26 }
  0x3a   :  { %1130 = vmatmul.msk.f32.gmra.mxu0 %vm117_vm1, %v107_v27 }
  0x97   :  { %v163_v35 = vpop.f32.mrf.mxu0  ;;  %v178_v51 = vpop.f32.mrf.mxu1 }
  0x98   :  { %v164_v36 = vadd.f32 %v1183_v34, %v163_v35  ;;  %v179_v56 = vadd.f32 %v1183_v34, %v178_v51  ;;  %v480_v51 = vld [vmem:[#allocation6] sm:$0xff] }
  0x9a   :  { %vm187_vm2 = vcmp.ge.f32.partialorder %v164_v36, 0.0  ;;  %v195_v37 = vmul.f32 0.01, %v164_v36  ;;  %v200_v59 = vmul.f32 0.01, %v179_v56  ;;  %vm192_vm8 = vcmp.ge.f32.partialorder %v179_v56, 0.0 }
  0x9c   :  { %v203_v38 = vsel %vm187_vm2, %v164_v36, %v195_v37  ;;  %v208_v61 = vsel %vm192_vm8, %v179_v56, %v200_v59  ;;  %v608_v56 = vld [vmem:[#allocation6 + $0x50] sm:$0xff]  ;;  %v534_v59 = vld [vmem:[#allocation6 + $0x20] sm:$0xff] }
  0x9d   :  { %1134 = vmatmul.msk.f32.vlgmr.msrb.gmra.mxu1 %vm227_vm3, %v203_v38  ;;  %1150 = vmatmul.msk.f32.vlgmr.msra.gmra.mxu3 %vm227_vm3, %v203_v38 }
  0x9f   :  { %v166_v39 = vpop.f32.mrf.mxu0  ;;  %v181_v58 = vpop.f32.mrf.mxu1 }
  0xa0   :  { %v167_v40 = vadd.f32 %v1183_v34, %v166_v39  ;;  %v182_v60 = vadd.f32 %v1183_v34, %v181_v58  ;;  %v607_v58 = vld [vmem:[#allocation6 + $0x48] sm:$0xff] }
  0xa2   :  { %v196_v41 = vmul.f32 0.01, %v167_v40  ;;  %vm188_vm4 = vcmp.ge.f32.partialorder %v167_v40, 0.0  ;;  %v201_v62 = vmul.f32 0.01, %v182_v60  ;;  %vm193_vm9 = vcmp.ge.f32.partialorder %v182_v60, 0.0 }
  0xa4   :  { %v204_v42 = vsel %vm188_vm4, %v167_v40, %v196_v41  ;;  %v209_v1 = vsel %vm193_vm9, %v182_v60, %v201_v62  ;;  %v606_v60 = vld [vmem:[#allocation6 + $0x40] sm:$0xff]  ;;  %v661_v62 = vld [vmem:[#allocation6 + $0x70] sm:$0xff] }
  0xa5   :  { %1135 = vmatmul.msk.f32.gmra.mxu1 %vm227_vm3, %v204_v42  ;;  %1151 = vmatmul.msk.f32.gmra.mxu3 %vm227_vm3, %v204_v42 }
  0xa7   :  { %v169_v43 = vpop.f32.mrf.mxu0  ;;  %v184_v63 = vpop.f32.mrf.mxu1 }
  0xa8   :  { %v170_v44 = vadd.f32 %v1183_v34, %v169_v43  ;;  %v185_v0 = vadd.f32 %v1183_v34, %v184_v63  ;;  %v477_v43 = vld [vmem:[#allocation2 + $0x8] sm:$0xff] }
  0xa9   :  { %528 = vmatpush.msrb.mxu2 %v477_v43  ;;  %v686_v43 = vld [vmem:[#allocation2 + $0x90] sm:$0xff] }
  0xaa   :  { %v197_v45 = vmul.f32 0.01, %v170_v44  ;;  %vm189_vm5 = vcmp.ge.f32.partialorder %v170_v44, 0.0  ;;  %v202_v2 = vmul.f32 0.01, %v185_v0  ;;  %vm194_vm10 = vcmp.ge.f32.partialorder %v185_v0, 0.0 }
  0xac   :  { %v205_v46 = vsel %vm189_vm5, %v170_v44, %v197_v45  ;;  %v210_v3 = vsel %vm194_vm10, %v185_v0, %v202_v2  ;;  %v486_v44 = vld [vmem:[#allocation2 + $0x30] sm:$0xff]  ;;  %v476_v45 = vld [vmem:[#allocation2] sm:$0xff]  ;;  %v660_v0 = vld [vmem:[#allocation6 + $0x68] sm:$0xff] }
  0xad   :  { %1136 = vmatmul.msk.f32.gmra.mxu1 %vm227_vm3, %v205_v46  ;;  %1152 = vmatmul.msk.f32.gmra.mxu3 %vm227_vm3, %v205_v46  ;;  %v483_v46 = vld [vmem:[#allocation6 + $0x18] sm:$0xff]  ;;  %v1527_v2 = vld [vmem:[%s1683_s7] ss:$0 sm:$0xff] }
  0xae   :  { %504 = vmatpush.msrb.mxu0 %v486_v44  ;;  %529 = vmatpush.msrb.mxu2 %v476_v45  ;;  %v820_v44 = vld [vmem:[#allocation6 + $0xd0] sm:$0xff] }
  0xaf   :  { %v172_v47 = vpop.f32.mrf.mxu0 }
  0xb0   :  { %v173_v48 = vadd.f32 %v1183_v34, %v172_v47  ;;  %v482_v47 = vld [vmem:[#allocation6 + $0x10] sm:$0xff] }
  0xb2   :  { %v198_v49 = vmul.f32 0.01, %v173_v48  ;;  %vm190_vm6 = vcmp.ge.f32.partialorder %v173_v48, 0.0 }
  0xb4   :  { %v206_v50 = vsel %vm190_vm6, %v173_v48, %v198_v49  ;;  %v485_v48 = vld [vmem:[#allocation2 + $0x28] sm:$0xff] }
  0xb5   :  { %1137 = vmatmul.msk.f32.gmra.mxu1 %vm227_vm3, %v206_v50  ;;  %1153 = vmatmul.msk.f32.gmra.mxu3 %vm227_vm3, %v206_v50  ;;  %v481_v49 = vld [vmem:[#allocation6 + $0x8] sm:$0xff]  ;;  %v484_v50 = vld [vmem:[#allocation2 + $0x20] sm:$0xff] }
  0xb6   :  { %505 = vmatpush.msrb.mxu0 %v485_v48  ;;  %v819_v48 = vld [vmem:[#allocation6 + $0xc8] sm:$0xff] }
  0xb7   :  { %v175_v53 = vpop.f32.mrf.mxu0 }
  0xb8   :  { %v176_v54 = vadd.f32 %v1183_v34, %v175_v53  ;;  %506 = vmatpush.msrb.mxu0 %v484_v50  ;;  %v609_v53 = vld [vmem:[#allocation6 + $0x58] sm:$0xff]  ;;  %v684_v50 = vld [vmem:[#allocation2 + $0x80] sm:$0xff] }
  0xb9   :  { %622 = vmatpush.msra.mxu1 %v609_v53  ;;  %v793_v53 = vld [vmem:[#allocation2 + $0xd8] sm:$0xff] }
  0xba   :  { %v199_v55 = vmul.f32 0.01, %v176_v54  ;;  %vm191_vm7 = vcmp.ge.f32.partialorder %v176_v54, 0.0  ;;  %550 = vmatpush.msra.mxu0 %v537_v52 }
  0xbb   :  { %623 = vmatpush.msra.mxu1 %v608_v56  ;;  %v874_v56 = vld [vmem:[#allocation6 + $0xf8] sm:$0xff] }
  0xbc   :  { %v207_v57 = vsel %vm191_vm7, %v176_v54, %v199_v55  ;;  %v536_v55 = vld [vmem:[#allocation6 + $0x30] sm:$0xff] }
  0xbd   :  { %1138 = vmatmul.msk.f32.gmra.mxu1 %vm227_vm3, %v207_v57  ;;  %1154 = vmatmul.msk.f32.gmra.mxu3 %vm227_vm3, %v207_v57  ;;  %v535_v57 = vld [vmem:[#allocation6 + $0x28] sm:$0xff] }
  0xbe   :  { %551 = vmatpush.msra.mxu0 %v536_v55  ;;  %624 = vmatpush.msra.mxu1 %v607_v58  ;;  %v846_v55 = vld [vmem:[#allocation2 + $0xf8] sm:$0xff]  ;;  %v792_v58 = vld [vmem:[#allocation2 + $0xd0] sm:$0xff] }
  0xc0   :  { %552 = vmatpush.msra.mxu0 %v535_v57  ;;  %625 = vmatpush.msra.mxu1 %v606_v60  ;;  %v845_v60 = vld [vmem:[#allocation2 + $0xf0] sm:$0xff] }
  0xc2   :  { %553 = vmatpush.msra.mxu0 %v534_v59  ;;  %728 = vmatpush.msrb.mxu1 %v715_v5 }
  0xc5   :  { %1139 = vmatmul.msk.f32.gmra.mxu1 %vm227_vm3, %v208_v61  ;;  %1155 = vmatmul.msk.f32.gmra.mxu3 %vm227_vm3, %v208_v61  ;;  %v662_v61 = vld [vmem:[#allocation6 + $0x78] sm:$0xff] }
  0xc6   :  { %675 = vmatpush.msrb.mxu3 %v662_v61  ;;  %v873_v61 = vld [vmem:[#allocation6 + $0xf0] sm:$0xff] }
  0xc8   :  { %676 = vmatpush.msrb.mxu3 %v661_v62  ;;  %v791_v62 = vld [vmem:[#allocation2 + $0xc8] sm:$0xff] }
  0xca   :  { %677 = vmatpush.msrb.mxu3 %v660_v0  ;;  %v844_v0 = vld [vmem:[#allocation2 + $0xe8] sm:$0xff] }
  0xcd   :  { %1140 = vmatmul.msk.f32.gmra.mxu1 %vm227_vm3, %v209_v1  ;;  %1156 = vmatmul.msk.f32.gmra.mxu3 %vm227_vm3, %v209_v1  ;;  %v659_v1 = vld [vmem:[#allocation6 + $0x60] sm:$0xff] }
  0xce   :  { %678 = vmatpush.msrb.mxu3 %v659_v1  ;;  %v872_v1 = vld [vmem:[#allocation6 + $0xe8] sm:$0xff] }
  0xd5   :  { %1141 = vmatmul.msk.f32.gmra.mxu1 %vm227_vm3, %v210_v3  ;;  %1157 = vmatmul.msk.f32.gmra.mxu3 %vm227_vm3, %v210_v3 }
 0x11a   :  { %v269_v8 = vpop.f32.mrf.mxu1 }
 0x11b   :  { %v270_v9 = vadd.f32 %v1184_v7, %v269_v8 }
 0x11d   :  { %v301_v10 = vmul.f32 0.01, %v270_v9  ;;  %vm293_vm11 = vcmp.ge.f32.partialorder %v270_v9, 0.0 }
 0x11f   :  { %v309_v11 = vsel %vm293_vm11, %v270_v9, %v301_v10  ;;  %v713_v9 = vld [vmem:[#allocation6 + $0x88] sm:$0xff] }
 0x120   :  { %1142 = vmatmul.msk.f32.vlgmr.msra.gmra.mxu2 %vm333_vm12, %v309_v11  ;;  %v416_v54 = vpop.f32.mrf.mxu3  ;;  %v634_v11 = vld [vmem:[#allocation2 + $0x78] sm:$0xff] }
 0x121   :  { %570 = vmatpush.msra.mxu2 %v483_v46 }
 0x122   :  { %v272_v12 = vpop.f32.mrf.mxu1 }
 0x123   :  { %v273_v13 = vadd.f32 %v1184_v7, %v272_v12  ;;  %571 = vmatpush.msra.mxu2 %v482_v47  ;;  %v712_v12 = vld [vmem:[#allocation6 + $0x80] sm:$0xff]  ;;  %v685_v47 = vld [vmem:[#allocation2 + $0x88] sm:$0xff] }
 0x125   :  { %v302_v14 = vmul.f32 0.01, %v273_v13  ;;  %vm294_vm13 = vcmp.ge.f32.partialorder %v273_v13, 0.0  ;;  %572 = vmatpush.msra.mxu2 %v481_v49 }
 0x127   :  { %v310_v15 = vsel %vm294_vm13, %v273_v13, %v302_v14  ;;  %573 = vmatpush.msra.mxu2 %v480_v51  ;;  %v818_v51 = vld [vmem:[#allocation6 + $0xc0] sm:$0xff] }
 0x128   :  { %1143 = vmatmul.msk.f32.gmra.mxu2 %vm333_vm12, %v310_v15  ;;  %v419_v63 = vpop.f32.mrf.mxu3  ;;  %v633_v15 = vld [vmem:[#allocation2 + $0x70] sm:$0xff] }
 0x12a   :  { %v275_v16 = vpop.f32.mrf.mxu1 }
 0x12b   :  { %v276_v17 = vadd.f32 %v1184_v7, %v275_v16 }
 0x12d   :  { %v303_v18 = vmul.f32 0.01, %v276_v17  ;;  %vm295_vm14 = vcmp.ge.f32.partialorder %v276_v17, 0.0 }
 0x12f   :  { %v311_v19 = vsel %vm295_vm14, %v276_v17, %v303_v18  ;;  %v768_v17 = vld [vmem:[#allocation6 + $0xb8] sm:$0xff]  ;;  %v632_v18 = vld [vmem:[#allocation2 + $0x68] sm:$0xff] }
 0x130   :  { %1144 = vmatmul.msk.f32.gmra.mxu2 %vm333_vm12, %v311_v19  ;;  %v422_v10 = vpop.f32.mrf.mxu3  ;;  %781 = vmatpush.msra.mxu3 %v768_v17 }
 0x132   :  { %v278_v20 = vpop.f32.mrf.mxu1 }
 0x133   :  { %v279_v21 = vadd.f32 %v1184_v7, %v278_v20  ;;  %v767_v20 = vld [vmem:[#allocation6 + $0xb0] sm:$0xff] }
 0x134   :  { %782 = vmatpush.msra.mxu3 %v767_v20 }
 0x135   :  { %v304_v22 = vmul.f32 0.01, %v279_v21  ;;  %vm296_vm15 = vcmp.ge.f32.partialorder %v279_v21, 0.0 }
 0x137   :  { %v312_v23 = vsel %vm296_vm15, %v279_v21, %v304_v22  ;;  %v631_v21 = vld [vmem:[#allocation2 + $0x60] sm:$0xff] }
 0x138   :  { %1145 = vmatmul.msk.f32.gmra.mxu2 %vm333_vm12, %v312_v23  ;;  %v766_v23 = vld [vmem:[#allocation6 + $0xa8] sm:$0xff] }
 0x139   :  { %783 = vmatpush.msra.mxu3 %v766_v23 }
 0x13a   :  { %v281_v27 = vpop.f32.mrf.mxu1 }
 0x13b   :  { %v282_v28 = vadd.f32 %v1184_v7, %v281_v27  ;;  %v765_v27 = vld [vmem:[#allocation6 + $0xa0] sm:$0xff] }
 0x13c   :  { %784 = vmatpush.msra.mxu3 %v765_v27  ;;  %v918_v27 = vld [vmem:[#allocation4 + $0x70] sm:$0xff] }
 0x13d   :  { %v305_v29 = vmul.f32 0.01, %v282_v28  ;;  %vm297_vm0 = vcmp.ge.f32.partialorder %v282_v28, 0.0 }
 0x13f   :  { %v313_v30 = vsel %vm297_vm0, %v282_v28, %v305_v29  ;;  %v425_v28 = vpop.f32.mrf.mxu3 }
 0x140   :  { %1146 = vmatmul.msk.f32.gmra.mxu2 %vm333_vm12, %v313_v30  ;;  %v580_v30 = vld [vmem:[#allocation2 + $0x50] sm:$0xff] }
 0x142   :  { %v284_v31 = vpop.f32.mrf.mxu1 }
 0x143   :  { %v285_v32 = vadd.f32 %v1184_v7, %v284_v31  ;;  %v739_v31 = vld [vmem:[#allocation2 + $0xb0] sm:$0xff] }
 0x145   :  { %v306_v33 = vmul.f32 0.01, %v285_v32  ;;  %vm298_vm1 = vcmp.ge.f32.partialorder %v285_v32, 0.0 }
 0x147   :  { %v314_v34 = vsel %vm298_vm1, %v285_v32, %v306_v33  ;;  %v579_v33 = vld [vmem:[#allocation2 + $0x48] sm:$0xff]  ;;  %v428_v46 = vpop.f32.mrf.mxu3 }
 0x148   :  { %1147 = vmatmul.msk.f32.gmra.mxu2 %vm333_vm12, %v314_v34  ;;  %v738_v34 = vld [vmem:[#allocation2 + $0xa8] sm:$0xff] }
 0x14a   :  { %v287_v35 = vpop.f32.mrf.mxu1 }
 0x14b   :  { %v288_v36 = vadd.f32 %v1184_v7, %v287_v35 }
 0x14d   :  { %v307_v37 = vmul.f32 0.01, %v288_v36  ;;  %vm299_vm2 = vcmp.ge.f32.partialorder %v288_v36, 0.0 }
 0x14f   :  { %v315_v38 = vsel %vm299_vm2, %v288_v36, %v307_v37  ;;  %v578_v36 = vld [vmem:[#allocation2 + $0x40] sm:$0xff] }
 0x150   :  { %1148 = vmatmul.msk.f32.gmra.mxu2 %vm333_vm12, %v315_v38  ;;  %v737_v37 = vld [vmem:[#allocation2 + $0xa0] sm:$0xff] }
 0x152   :  { %v290_v39 = vpop.f32.mrf.mxu1 }
 0x153   :  { %v291_v40 = vadd.f32 %v1184_v7, %v290_v39  ;;  %v714_v7 = vld [vmem:[#allocation6 + $0x90] sm:$0xff]  ;;  %v687_v39 = vld [vmem:[#allocation2 + $0x98] sm:$0xff] }
 0x154   :  { %729 = vmatpush.msrb.mxu1 %v714_v7  ;;  %v871_v7 = vld [vmem:[#allocation6 + $0xe0] sm:$0xff] }
 0x155   :  { %v308_v41 = vmul.f32 0.01, %v291_v40  ;;  %vm300_vm3 = vcmp.ge.f32.partialorder %v291_v40, 0.0 }
 0x156   :  { %730 = vmatpush.msrb.mxu1 %v713_v9 }
 0x157   :  { %v316_v42 = vsel %vm300_vm3, %v291_v40, %v308_v41  ;;  %v821_v40 = vld [vmem:[#allocation6 + $0xd8] sm:$0xff] }
 0x158   :  { %1149 = vmatmul.msk.f32.gmra.mxu2 %vm333_vm12, %v316_v42  ;;  %731 = vmatpush.msrb.mxu1 %v712_v12 }
 0x1a3   :  { %v375_v3 = vpop.f32.mrf.mxu2 }
 0x1a4   :  { %v417_v4 = vadd.f32 %v416_v54, %v375_v3  ;;  %v431_v3 = vpop.f32.mrf.mxu3 }
 0x1a6   :  { %v444_v6 = vadd.f32 %v1527_v2, %v417_v4  ;;  %v790_v4 = vld [vmem:[#allocation2 + $0xc0] sm:$0xff] }
 0x1a8   :  { %v460_v8 = vmul.f32 0.01, %v444_v6  ;;  %vm452_vm4 = vcmp.ge.f32.partialorder %v444_v6, 0.0 }
 0x1aa   :  { %v468_v13 = vsel %vm452_vm4, %v444_v6, %v460_v8  ;;  %v843_v6 = vld [vmem:[#allocation2 + $0xe0] sm:$0xff] }
 0x1ab   :  { %v378_v14 = vpop.f32.mrf.mxu2  ;;  %1159 = vmatmul.msk.f32.vlgmr.msrb.gmra.mxu2 %vm333_vm12, %v468_v13 }
 0x1ac   :  { %v420_v16 = vadd.f32 %v419_v63, %v378_v14  ;;  %650 = vmatpush.msrb.mxu2 %v634_v11 }
 0x1ae   :  { %v445_v19 = vadd.f32 %v1527_v2, %v420_v16  ;;  %651 = vmatpush.msrb.mxu2 %v633_v15 }
 0x1b0   :  { %v461_v22 = vmul.f32 0.01, %v445_v19  ;;  %vm453_vm5 = vcmp.ge.f32.partialorder %v445_v19, 0.0  ;;  %652 = vmatpush.msrb.mxu2 %v632_v18 }
 0x1b2   :  { %v469_v26 = vsel %vm453_vm5, %v445_v19, %v461_v22  ;;  %653 = vmatpush.msrb.mxu2 %v631_v21 }
 0x1b3   :  { %v381_v29 = vpop.f32.mrf.mxu2  ;;  %1158 = vmatmul.msk.f32.vlgmr.msrb.gmra.mxu0 %vm333_vm12, %v469_v26  ;;  %1161 = vmatmul.msk.f32.vlgmr.msra.gmra.mxu2 %vm333_vm12, %v468_v13  ;;  %v434_v13 = vpop.f32.mrf.mxu3 }
 0x1b4   :  { %v423_v32 = vadd.f32 %v422_v10, %v381_v29  ;;  %597 = vmatpush.msrb.mxu0 %v581_v24  ;;  %756 = vmatpush.msra.mxu2 %v740_v25 }
 0x1b6   :  { %v446_v35 = vadd.f32 %v1527_v2, %v423_v32  ;;  %598 = vmatpush.msrb.mxu0 %v580_v30  ;;  %757 = vmatpush.msra.mxu2 %v739_v31  ;;  %v916_v30 = vld [vmem:[#allocation4 + $0x60] sm:$0xff]  ;;  %v915_v32 = vld [vmem:[#allocation4 + $0x58] sm:$0xff] }
 0x1b8   :  { %vm454_vm6 = vcmp.ge.f32.partialorder %v446_v35, 0.0  ;;  %v462_v38 = vmul.f32 0.01, %v446_v35  ;;  %599 = vmatpush.msrb.mxu0 %v579_v33  ;;  %758 = vmatpush.msra.mxu2 %v738_v34 }
 0x1ba   :  { %v470_v41 = vsel %vm454_vm6, %v446_v35, %v462_v38  ;;  %600 = vmatpush.msrb.mxu0 %v578_v36  ;;  %759 = vmatpush.msra.mxu2 %v737_v37  ;;  %v914_v35 = vld [vmem:[#allocation4 + $0x50] sm:$0xff]  ;;  %v913_v36 = vld [vmem:[#allocation4 + $0x48] sm:$0xff] }
 0x1bb   :  { %v384_v42 = vpop.f32.mrf.mxu2  ;;  %1160 = vmatmul.msk.f32.vlgmr.msra.gmra.mxu0 %vm333_vm12, %v469_v26  ;;  %1163 = vmatmul.msk.f32.vlgmr.msra.gmra.mxu1 %vm333_vm12, %v470_v41  ;;  %v437_v20 = vpop.f32.mrf.mxu3  ;;  %v919_v26 = vld [vmem:[#allocation4 + $0x78] sm:$0xff] }
 0x1bc   :  { %v426_v45 = vadd.f32 %v425_v28, %v384_v42  ;;  %703 = vmatpush.msra.mxu0 %v687_v39  ;;  %834 = vmatpush.msra.mxu1 %v821_v40  ;;  %v917_v28 = vld [vmem:[#allocation4 + $0x68] sm:$0xff]  ;;  %v912_v39 = vld [vmem:[#allocation4 + $0x40] sm:$0xff]  ;;  %v911_v40 = vld [vmem:[#allocation4 + $0x38] sm:$0xff] }
 0x1bd   :  { %v909_v42 = vld [vmem:[#allocation4 + $0x28] sm:$0xff] }
 0x1be   :  { %v447_v49 = vadd.f32 %v1527_v2, %v426_v45  ;;  %704 = vmatpush.msra.mxu0 %v686_v43  ;;  %835 = vmatpush.msra.mxu1 %v820_v44  ;;  %v908_v43 = vld [vmem:[#allocation4 + $0x20] sm:$0xff]  ;;  %v907_v45 = vld [vmem:[#allocation4 + $0x18] sm:$0xff] }
 0x1c0   :  { %vm455_vm7 = vcmp.ge.f32.partialorder %v447_v49, 0.0  ;;  %v463_v52 = vmul.f32 0.01, %v447_v49  ;;  %705 = vmatpush.msra.mxu0 %v685_v47  ;;  %836 = vmatpush.msra.mxu1 %v819_v48  ;;  %v906_v48 = vld [vmem:[#allocation4 + $0x10] sm:$0xff] }
 0x1c2   :  { %v471_v54 = vsel %vm455_vm7, %v447_v49, %v463_v52  ;;  %706 = vmatpush.msra.mxu0 %v684_v50  ;;  %837 = vmatpush.msra.mxu1 %v818_v51  ;;  %v905_v50 = vld [vmem:[#allocation4 + $0x8] sm:$0xff]  ;;  %v904_v51 = vld [vmem:[#allocation4] sm:$0xff]  ;;  %v963_v52 = vld [vmem:[#allocation4 + $0xf8] sm:$0xff] }
 0x1c3   :  { %v387_v57 = vpop.f32.mrf.mxu2  ;;  %1162 = vmatmul.msk.f32.vlgmr.msrb.gmra.mxu0 %vm333_vm12, %v470_v41  ;;  %1164 = vmatmul.msk.f32.vlgmr.msrb.gmra.mxu2 %vm333_vm12, %v471_v54  ;;  %v910_v41 = vld [vmem:[#allocation4 + $0x30] sm:$0xff] }
 0x1c4   :  { %v429_v59 = vadd.f32 %v428_v46, %v387_v57  ;;  %1165 = vmatmul.msk.f32.vlgmr.msrb.gmra.mxu3 %vm333_vm12, %v471_v54  ;;  %809 = vmatpush.msrb.mxu0 %v793_v53  ;;  %v962_v53 = vld [vmem:[#allocation4 + $0xf0] sm:$0xff]  ;;  %v959_v57 = vld [vmem:[#allocation4 + $0xd8] sm:$0xff] }
 0x1c5   :  { %862 = vmatpush.msrb.mxu2 %v846_v55  ;;  %887 = vmatpush.msrb.mxu3 %v874_v56  ;;  %v961_v55 = vld [vmem:[#allocation4 + $0xe8] sm:$0xff]  ;;  %v960_v56 = vld [vmem:[#allocation4 + $0xe0] sm:$0xff] }
 0x1c6   :  { %v448_v63 = vadd.f32 %v1527_v2, %v429_v59  ;;  %810 = vmatpush.msrb.mxu0 %v792_v58 }
 0x1c7   :  { %863 = vmatpush.msrb.mxu2 %v845_v60  ;;  %888 = vmatpush.msrb.mxu3 %v873_v61  ;;  %v958_v60 = vld [vmem:[#allocation4 + $0xd0] sm:$0xff] }
 0x1c8   :  { %vm456_vm8 = vcmp.ge.f32.partialorder %v448_v63, 0.0  ;;  %v464_v5 = vmul.f32 0.01, %v448_v63  ;;  %811 = vmatpush.msrb.mxu0 %v791_v62 }
 0x1c9   :  { %864 = vmatpush.msrb.mxu2 %v844_v0  ;;  %889 = vmatpush.msrb.mxu3 %v872_v1 }
 0x1ca   :  { %v472_v8 = vsel %vm456_vm8, %v448_v63, %v464_v5  ;;  %812 = vmatpush.msrb.mxu0 %v790_v4  ;;  %v957_v63 = vld [vmem:[#allocation4 + $0xc8] sm:$0xff]  ;;  %v955_v5 = vld [vmem:[#allocation4 + $0xb8] sm:$0xff] }
 0x1cb   :  { %v390_v9 = vpop.f32.mrf.mxu2  ;;  %1166 = vmatmul.msk.f32.vlgmr.msra.gmra.mxu0 %vm333_vm12, %v472_v8  ;;  %1167 = vmatmul.msk.f32.vlgmr.msrb.gmra.mxu1 %vm333_vm12, %v472_v8 }
 0x1cc   :  { %v432_v10 = vadd.f32 %v431_v3, %v390_v9  ;;  %865 = vmatpush.msrb.mxu2 %v843_v6  ;;  %890 = vmatpush.msrb.mxu3 %v871_v7  ;;  %v956_v3 = vld [vmem:[#allocation4 + $0xc0] sm:$0xff]  ;;  %v954_v7 = vld [vmem:[#allocation4 + $0xb0] sm:$0xff]  ;;  %v953_v9 = vld [vmem:[#allocation4 + $0xa8] sm:$0xff] }
 0x1cd   :  { %924 = vmatpush.msra.mxu0 %v919_v26  ;;  %969 = vmatpush.msrb.mxu1 %v963_v52  ;;  %v1006_v26 = vld [vmem:[#allocation4 + $0x168] sm:$0xff]  ;;  %v1044_v52 = vld [vmem:[%s1688_s12 + $0x38] sm:$0xff] }
 0x1ce   :  { %v449_v11 = vadd.f32 %v1527_v2, %v432_v10 }
 0x1cf   :  { %925 = vmatpush.msra.mxu0 %v918_v27  ;;  %970 = vmatpush.msrb.mxu1 %v962_v53  ;;  %v1005_v27 = vld [vmem:[#allocation4 + $0x160] sm:$0xff]  ;;  %v1043_v53 = vld [vmem:[%s1688_s12 + $0x30] sm:$0xff] }
 0x1d0   :  { %vm457_vm9 = vcmp.ge.f32.partialorder %v449_v11, 0.0  ;;  %v465_v12 = vmul.f32 0.01, %v449_v11 }
 0x1d1   :  { %926 = vmatpush.msra.mxu0 %v917_v28  ;;  %971 = vmatpush.msrb.mxu1 %v961_v55  ;;  %v1004_v28 = vld [vmem:[#allocation4 + $0x158] sm:$0xff]  ;;  %v1042_v55 = vld [vmem:[%s1688_s12 + $0x28] sm:$0xff] }
 0x1d2   :  { %v473_v14 = vsel %vm457_vm9, %v449_v11, %v465_v12  ;;  %v952_v12 = vld [vmem:[#allocation4 + $0xa0] sm:$0xff] }
 0x1d3   :  { %v393_v15 = vpop.f32.mrf.mxu2  ;;  %1168 = vmatmul.msk.f32.vlgmr.msra.gmra.mxu2 %vm333_vm12, %v473_v14  ;;  %1169 = vmatmul.msk.f32.vlgmr.msra.gmra.mxu3 %vm333_vm12, %v473_v14 }
 0x1d4   :  { %v435_v16 = vadd.f32 %v434_v13, %v393_v15  ;;  %927 = vmatpush.msra.mxu0 %v916_v30  ;;  %972 = vmatpush.msrb.mxu1 %v960_v56  ;;  %v951_v13 = vld [vmem:[#allocation4 + $0x98] sm:$0xff]  ;;  %v1186_v15 = vld [vmem:[%s1685_s9] ss:$0 sm:$0xff]  ;;  %v1002_v30 = vld [vmem:[#allocation4 + $0x148] sm:$0xff] }
 0x1d5   :  { %v1041_v56 = vld [vmem:[%s1688_s12 + $0x20] sm:$0xff] }
 0x1d6   :  { %v450_v17 = vadd.f32 %v1527_v2, %v435_v16  ;;  %928 = vmatpush.msra.mxu0 %v915_v32  ;;  %973 = vmatpush.msrb.mxu1 %v959_v57  ;;  %v1000_v32 = vld [vmem:[#allocation4 + $0x138] sm:$0xff] }
 0x1d7   :  { %v1040_v57 = vld [vmem:[%s1688_s12 + $0x18] sm:$0xff] }
 0x1d8   :  { %vm458_vm10 = vcmp.ge.f32.partialorder %v450_v17, 0.0  ;;  %v466_v18 = vmul.f32 0.01, %v450_v17  ;;  %929 = vmatpush.msra.mxu0 %v914_v35  ;;  %974 = vmatpush.msrb.mxu1 %v958_v60  ;;  %v996_v35 = vld [vmem:[#allocation4 + $0x118] sm:$0xff] }
 0x1da   :  { %v474_v19 = vsel %vm458_vm10, %v450_v17, %v466_v18  ;;  %930 = vmatpush.msra.mxu0 %v913_v36  ;;  %975 = vmatpush.msrb.mxu1 %v957_v63  ;;  %v1187_v36 = vld [vmem:[%s1687_s11] ss:$0 sm:$0xff] }
 0x1db   :  { %v396_v21 = vpop.f32.mrf.mxu2  ;;  %1170 = vmatmul.msk.f32.vlgmr.msrb.gmra.mxu0 %vm333_vm12, %v474_v19  ;;  %1171 = vmatmul.msk.f32.vlgmr.msra.gmra.mxu1 %vm333_vm12, %v474_v19 }
 0x1dc   :  { %v438_v22 = vadd.f32 %v437_v20, %v396_v21  ;;  %931 = vmatpush.msra.mxu0 %v912_v39  ;;  %976 = vmatpush.msrb.mxu1 %v956_v3  ;;  %v950_v21 = vld [vmem:[#allocation4 + $0x90] sm:$0xff]  ;;  %v1037_v3 = vld [vmem:[%s1688_s12] sm:$0xff] }
 0x1de   :  { %v451_v23 = vadd.f32 %v1527_v2, %v438_v22  ;;  %932 = vmatpush.msra.mxu0 %v911_v40  ;;  %977 = vmatpush.msrb.mxu1 %v955_v5  ;;  %v949_v22 = vld [vmem:[#allocation4 + $0x88] sm:$0xff]  ;;  %v1091_v5 = vld [vmem:[%s1690_s14 + $0x70] sm:$0xff] }
 0x1e0   :  { %vm459_vm11 = vcmp.ge.f32.partialorder %v451_v23, 0.0  ;;  %v467_v24 = vmul.f32 0.01, %v451_v23  ;;  %933 = vmatpush.msra.mxu0 %v910_v41  ;;  %978 = vmatpush.msrb.mxu1 %v954_v7  ;;  %v995_v41 = vld [vmem:[#allocation4 + $0x110] sm:$0xff]  ;;  %v1089_v7 = vld [vmem:[%s1690_s14 + $0x60] sm:$0xff] }
 0x1e2   :  { %v475_v25 = vsel %vm459_vm11, %v451_v23, %v467_v24  ;;  %934 = vmatpush.msra.mxu0 %v909_v42  ;;  %979 = vmatpush.msrb.mxu1 %v953_v9  ;;  %v948_v23 = vld [vmem:[#allocation4 + $0x80] sm:$0xff]  ;;  %v1008_v24 = vld [vmem:[#allocation4 + $0x178] sm:$0xff]  ;;  %v994_v42 = vld [vmem:[#allocation4 + $0x108] sm:$0xff] }
 0x1e3   :  { %1172 = vmatmul.msk.f32.vlgmr.msrb.gmra.mxu2 %vm333_vm12, %v475_v25  ;;  %1173 = vmatmul.msk.f32.vlgmr.msrb.gmra.mxu3 %vm333_vm12, %v475_v25  ;;  %v1007_v25 = vld [vmem:[#allocation4 + $0x170] sm:$0xff] }
 0x1e4   :  { %935 = vmatpush.msra.mxu0 %v908_v43  ;;  %980 = vmatpush.msrb.mxu1 %v952_v12  ;;  %v993_v43 = vld [vmem:[#allocation4 + $0x100] sm:$0xff]  ;;  %v1087_v9 = vld [vmem:[%s1690_s14 + $0x50] sm:$0xff]  ;;  %v1084_v12 = vld [vmem:[%s1690_s14 + $0x38] sm:$0xff] }
 0x1e5   :  { %1014 = vmatpush.msra.mxu2 %v1008_v24  ;;  %v1077_v24 = vld [vmem:[%s1690_s14] sm:$0xff] }
 0x1e6   :  { %936 = vmatpush.msra.mxu0 %v907_v45  ;;  %981 = vmatpush.msrb.mxu1 %v951_v13  ;;  %v1051_v45 = vld [vmem:[%s1688_s12 + $0x70] sm:$0xff] }
 0x1e7   :  { %1015 = vmatpush.msra.mxu2 %v1007_v25  ;;  %v1083_v13 = vld [vmem:[%s1690_s14 + $0x30] sm:$0xff] }
 0x1e8   :  { %937 = vmatpush.msra.mxu0 %v906_v48  ;;  %982 = vmatpush.msrb.mxu1 %v950_v21  ;;  %v1048_v48 = vld [vmem:[%s1688_s12 + $0x58] sm:$0xff] }
 0x1e9   :  { %1016 = vmatpush.msra.mxu2 %v1006_v26  ;;  %v1190_v26 = vld [vmem:[%s1689_s13] ss:$0 sm:$0xff] }
 0x1ea   :  { %938 = vmatpush.msra.mxu0 %v905_v50  ;;  %983 = vmatpush.msrb.mxu1 %v949_v22  ;;  %v1046_v50 = vld [vmem:[%s1688_s12 + $0x48] sm:$0xff] }
 0x1eb   :  { %1017 = vmatpush.msra.mxu2 %v1005_v27 }
 0x1ec   :  { %939 = vmatpush.msra.mxu0 %v904_v51  ;;  %984 = vmatpush.msrb.mxu1 %v948_v23  ;;  %v1045_v51 = vld [vmem:[%s1688_s12 + $0x40] sm:$0xff]  ;;  %v1078_v23 = vld [vmem:[%s1690_s14 + $0x8] sm:$0xff] }
 0x1ed   :  { %1018 = vmatpush.msra.mxu2 %v1004_v28 }
 0x22e   :  { %v531_v29 = vpop.f32.mrf.mxu2 }
 0x230   :  { %v508_v31 = vpop.f32.mrf.mxu0 }
 0x231   :  { %v532_v61 = vadd.f32 %v531_v29, %v508_v31  ;;  %v1003_v29 = vld [vmem:[#allocation4 + $0x150] sm:$0xff]  ;;  %v1001_v31 = vld [vmem:[#allocation4 + $0x140] sm:$0xff] }
 0x232   :  { %1019 = vmatpush.msra.mxu2 %v1003_v29 }
 0x234   :  { %1020 = vmatpush.msra.mxu2 %v1002_v30 }
 0x236   :  { %v575_v33 = vpop.f32.mrf.mxu2  ;;  %1021 = vmatpush.msra.mxu2 %v1001_v31  ;;  %v1191_v31 = vld [vmem:[%s1692_s16] ss:$0 sm:$0xff] }
 0x238   :  { %v555_v2 = vpop.f32.mrf.mxu0  ;;  %v627_v37 = vpop.f32.mrf.mxu1  ;;  %1022 = vmatpush.msra.mxu2 %v1000_v32 }
 0x239   :  { %v576_v34 = vadd.f32 %v575_v33, %v555_v2  ;;  %v999_v33 = vld [vmem:[#allocation4 + $0x130] sm:$0xff]  ;;  %v998_v2 = vld [vmem:[#allocation4 + $0x128] sm:$0xff] }
 0x23a   :  { %1023 = vmatpush.msra.mxu2 %v999_v33 }
 0x23b   :  { %v630_v38 = vadd.f32 %v627_v37, %v576_v34  ;;  %v997_v34 = vld [vmem:[#allocation4 + $0x120] sm:$0xff] }
 0x23c   :  { %1024 = vmatpush.msra.mxu2 %v998_v2 }
 0x23e   :  { %1025 = vmatpush.msra.mxu2 %v997_v34 }
 0x240   :  { %v602_v54 = vpop.f32.mrf.mxu0  ;;  %1026 = vmatpush.msra.mxu2 %v996_v35 }
 0x241   :  { %v605_v0 = vadd.f32 %v602_v54, %v532_v61 }
 0x242   :  { %1027 = vmatpush.msra.mxu2 %v995_v41 }
 0x244   :  { %1028 = vmatpush.msra.mxu2 %v994_v42 }
 0x246   :  { %v655_v58 = vpop.f32.mrf.mxu2  ;;  %1029 = vmatpush.msra.mxu2 %v993_v43 }
 0x247   :  { %v680_v44 = vpop.f32.mrf.mxu3  ;;  %v658_v4 = vadd.f32 %v655_v58, %v605_v0  ;;  %v1188_v58 = vld [vmem:[%s1687_s11 + $0x1] ss:$0 sm:$0xff]  ;;  %v1039_v0 = vld [vmem:[%s1688_s12 + $0x10] sm:$0xff] }
 0x248   :  { %v683_v46 = vadd.f32 %v680_v44, %v630_v38  ;;  %v733_v47 = vpop.f32.mrf.mxu1  ;;  %v708_v1 = vpop.f32.mrf.mxu0  ;;  %v1052_v44 = vld [vmem:[%s1688_s12 + $0x78] sm:$0xff] }
 0x249   :  { %v711_v8 = vadd.f32 %v708_v1, %v658_v4  ;;  %1057 = vmatpush.msra.mxu3 %v1052_v44  ;;  %v1038_v1 = vld [vmem:[%s1688_s12 + $0x8] sm:$0xff]  ;;  %v1092_v4 = vld [vmem:[%s1690_s14 + $0x78] sm:$0xff] }
 0x24a   :  { %v736_v49 = vadd.f32 %v733_v47, %v683_v46  ;;  %v1050_v46 = vld [vmem:[%s1688_s12 + $0x68] sm:$0xff]  ;;  %v1049_v47 = vld [vmem:[%s1688_s12 + $0x60] sm:$0xff]  ;;  %1093 = vmatpush.msrb.mxu0 %v1092_v4 }
 0x24b   :  { %1058 = vmatpush.msra.mxu3 %v1051_v45 }
 0x24c   :  { %1094 = vmatpush.msrb.mxu0 %v1091_v5 }
 0x24d   :  { %1059 = vmatpush.msra.mxu3 %v1050_v46 }
 0x24f   :  { %1060 = vmatpush.msra.mxu3 %v1049_v47 }
 0x251   :  { %1061 = vmatpush.msra.mxu3 %v1048_v48 }
 0x256   :  { %v786_v59 = vpop.f32.mrf.mxu3  ;;  %v761_v6 = vpop.f32.mrf.mxu2 }
 0x257   :  { %v1553_v62 = vadd.f32 %v786_v59, %v736_v49  ;;  %v764_v10 = vadd.f32 %v761_v6, %v711_v8  ;;  %v1047_v49 = vld [vmem:[%s1688_s12 + $0x50] sm:$0xff]  ;;  %v1090_v6 = vld [vmem:[%s1690_s14 + $0x68] sm:$0xff]  ;;  %v1088_v8 = vld [vmem:[%s1690_s14 + $0x58] sm:$0xff] }
 0x258   :  { %v814_v11 = vpop.f32.mrf.mxu0  ;;  %1062 = vmatpush.msra.mxu3 %v1047_v49  ;;  %v1591_v54 = vpop.f32.mrf.mxu1  ;;  %1095 = vmatpush.msrb.mxu0 %v1090_v6 }
 0x259   :  { %v817_v14 = vadd.f32 %v814_v11, %v764_v10  ;;  %v1086_v10 = vld [vmem:[%s1690_s14 + $0x48] sm:$0xff]  ;;  %v1085_v11 = vld [vmem:[%s1690_s14 + $0x40] sm:$0xff]  ;;  %v842_v29 = vadd.f32 %v1591_v54, %v1553_v62 }
 0x25a   :  { %1063 = vmatpush.msra.mxu3 %v1046_v50  ;;  %1096 = vmatpush.msrb.mxu0 %v1089_v7 }
 0x25c   :  { %1064 = vmatpush.msra.mxu3 %v1045_v51  ;;  %1097 = vmatpush.msrb.mxu0 %v1088_v8 }
 0x25e   :  { %1065 = vmatpush.msra.mxu3 %v1044_v52  ;;  %1098 = vmatpush.msrb.mxu0 %v1087_v9 }
 0x260   :  { %1066 = vmatpush.msra.mxu3 %v1043_v53  ;;  %1099 = vmatpush.msrb.mxu0 %v1086_v10 }
 0x262   :  { %1067 = vmatpush.msra.mxu3 %v1042_v55  ;;  %1100 = vmatpush.msrb.mxu0 %v1085_v11 }
 0x264   :  { %1068 = vmatpush.msra.mxu3 %v1041_v56  ;;  %1101 = vmatpush.msrb.mxu0 %v1084_v12 }
 0x266   :  { %v867_v16 = vpop.f32.mrf.mxu2  ;;  %1069 = vmatpush.msra.mxu3 %v1040_v57  ;;  %1102 = vmatpush.msrb.mxu0 %v1083_v13  ;;  %v892_v25 = vpop.f32.mrf.mxu3 }
 0x267   :  { %v870_v17 = vadd.f32 %v867_v16, %v817_v14  ;;  %v1082_v14 = vld [vmem:[%s1690_s14 + $0x28] sm:$0xff]  ;;  %v1080_v16 = vld [vmem:[%s1690_s14 + $0x18] sm:$0xff]  ;;  %v895_v30 = vadd.f32 %v892_v25, %v842_v29 }
 0x268   :  { %1070 = vmatpush.msra.mxu3 %v1039_v0  ;;  %1103 = vmatpush.msrb.mxu0 %v1082_v14 }
 0x269   :  { %v900_v18 = vadd.f32 %v1186_v15, %v870_v17  ;;  %v1081_v15 = vld [vmem:[%s1690_s14 + $0x20] sm:$0xff] }
 0x26a   :  { %1071 = vmatpush.msra.mxu3 %v1038_v1  ;;  %v1189_v17 = vld [vmem:[%s1687_s11 + $0x2] ss:$0 sm:$0xff]  ;;  %1104 = vmatpush.msrb.mxu0 %v1081_v15 }
 0x26b   :  { %v902_v19 = vmul.f32 0.01, %v900_v18  ;;  %vm901_vm12 = vcmp.ge.f32.partialorder %v900_v18, 0.0 }
 0x26c   :  { %1072 = vmatpush.msra.mxu3 %v1037_v3  ;;  %1105 = vmatpush.msrb.mxu0 %v1080_v16 }
 0x26d   :  { %v903_v20 = vsel %vm901_vm12, %v900_v18, %v902_v19  ;;  %v1079_v18 = vld [vmem:[%s1690_s14 + $0x10] sm:$0xff] }
 0x26e   :  { %940 = vmatmul.f32.vlgmr.msra.gmra.mxu0 %v903_v20 }
 0x26f   :  { %1106 = vmatpush.msrb.mxu0 %v1079_v18 }
 0x271   :  { %1107 = vmatpush.msrb.mxu0 %v1078_v23 }
 0x273   :  { %1108 = vmatpush.msrb.mxu0 %v1077_v24 }
 0x2eb   :  { %v941_v37 = vpop.f32.mrf.mxu0 }
 0x2ec   :  { %v942_v38 = vadd.f32 %v1187_v36, %v941_v37 }
 0x2ee   :  { %vm944_vm13 = vcmp.ge.f32.partialorder %v942_v38, 0.0  ;;  %v945_v39 = vmul.f32 0.01, %v942_v38 }
 0x2f0   :  { %v946_v40 = vsel %vm944_vm13, %v942_v38, %v945_v39 }
 0x2f1   :  { %985 = vmatmul.f32.vlgmr.msrb.gmra.mxu1 %v946_v40 }
 0x36e   :  { %v986_v59 = vpop.f32.mrf.mxu1 }
 0x36f   :  { %v987_v60 = vadd.f32 %v1188_v58, %v986_v59 }
 0x371   :  { %vm989_vm14 = vcmp.ge.f32.partialorder %v987_v60, 0.0  ;;  %v990_v61 = vmul.f32 0.01, %v987_v60 }
 0x373   :  { %v991_v63 = vsel %vm989_vm14, %v987_v60, %v990_v61 }
 0x374   :  { %1030 = vmatmul.f32.vlgmr.msra.gmra.mxu2 %v991_v63 }
 0x3f7   :  { %v1031_v19 = vpop.f32.mrf.mxu2 }
 0x3f8   :  { %v1032_v20 = vadd.f32 %v1189_v17, %v1031_v19 }
 0x3fa   :  { %vm1034_vm15 = vcmp.ge.f32.partialorder %v1032_v20, 0.0  ;;  %v1035_v21 = vmul.f32 0.01, %v1032_v20 }
 0x3fc   :  { %v1036_v22 = vsel %vm1034_vm15, %v1032_v20, %v1035_v21 }
 0x3fd   :  { %1073 = vmatmul.f32.vlgmr.msra.gmra.mxu3 %v1036_v22 }
 0x480   :  { %v1074_v27 = vpop.f32.mrf.mxu3 }
 0x481   :  { %v1075_v28 = vadd.f32 %v1190_v26, %v1074_v27 }
 0x483   :  { %1109 = vmatmul.f32.vlgmr.msrb.gmra.mxu0 %v1075_v28 }
 0x500   :  { %v1110_v32 = vpop.f32.mrf.mxu0 }
 0x501   :  { %v1111_v33 = vadd.f32 %v1110_v32, %v895_v30 }
 0x503   :  { %v1117_v2 = vadd.f32 %v1191_v31, %v1111_v33 }
 0x505   :  { %1118 = vst [vmem:[%s1693_s17] sm:$0xff] %v1117_v2 }
 0x506   :  { %1123 = vsyncpa [#allocation3], 1 }
 0x507   :  { %1124 = vsyncpa [#allocation5], 1 }

</bundles_post_ra>
